<compile_context>
chip_gen: v6e
topology: v6e:2x2x1
jax: 0.10.0
libtpu: 0.0.40
codegen_flags: <defaults>
</compile_context>

<pallas_src>
import functools

import jax
import jax.numpy as jnp
from jax.experimental import pallas as pl
from jax.experimental.pallas import tpu as pltpu


# ----------------------------------------------------------------------------
# Fused kernel: stacked length-masked LSTM + linear logits head.
# ----------------------------------------------------------------------------
def _smiles_fused_kernel(num_layers, seq_len, batch, hidden, *refs):
    T, B, H = seq_len, batch, hidden
    n_in = 2 + 3 * num_layers + 2

    x_ref, len_ref = refs[0], refs[1]
    lstm_refs = refs[2:2 + 3 * num_layers]
    ow_ref, ob_ref = refs[2 + 3 * num_layers], refs[3 + 3 * num_layers]
    logits_ref = refs[n_in]
    xw_scr, seq_scr = refs[n_in + 1:]

    lengths = len_ref[...]                                       # (B, 1) int32
    # Static lane mask selecting the tanh (g) lanes of the [i, f, g, o] layout;
    # hoisted once outside all loops (JAX does not CSE broadcasts).
    lane = jax.lax.broadcasted_iota(jnp.int32, (B, 4 * H), 1)
    is_g_lane = jnp.logical_and(lane >= 2 * H, lane < 3 * H)

    h_final = None
    for layer in range(num_layers):
        w_ih = lstm_refs[3 * layer][...]                         # (D_in, 4H) bf16
        w_hh = lstm_refs[3 * layer + 1][...]                     # (H,    4H) bf16
        b = lstm_refs[3 * layer + 2][...]                        # (1,    4H) f32

        if layer == 0:
            x_seq = x_ref[...].astype(jnp.bfloat16)              # (T*B, D)
        else:
            x_seq = seq_scr[...]                                 # (T*B, H) bf16

        # Hoisted input projection for the WHOLE sequence: one MXU matmul.
        xw_scr[...] = jnp.dot(x_seq, w_ih,
                              preferred_element_type=jnp.float32) + b

        write_seq = layer < num_layers - 1                       # next-layer input

        def step(t, carry):
            h, c = carry                                         # (B, H) f32 vregs
            row = pl.multiple_of(t * B, B)
            gates = (xw_scr[pl.ds(row, B), :]
                     + jnp.dot(h.astype(jnp.bfloat16), w_hh,
                               preferred_element_type=jnp.float32))  # (B, 4H)
            # Single EUP push for all four gates:
            #   sigmoid(x) = 0.5 * (tanh(x / 2) + 1)
            # g lanes get tanh(x) directly; i/f/o lanes get sigmoid via the
            # halved-argument tanh. PyTorch gate order [i, f, g, o].
            y = jnp.tanh(jnp.where(is_g_lane, gates, 0.5 * gates))
            act = jnp.where(is_g_lane, y, 0.5 * (y + 1.0))
            i_g = act[:, 0 * H:1 * H]
            f_g = act[:, 1 * H:2 * H]
            g_g = act[:, 2 * H:3 * H]
            o_g = act[:, 3 * H:4 * H]
            c_new = f_g * c + i_g * g_g
            h_new = o_g * jnp.tanh(c_new)
            # pack_padded emulation: freeze state past the sequence length.
            live = t < lengths                                   # (B, 1) bool
            h_out = jnp.where(live, h_new, h)
            c_out = jnp.where(live, c_new, c)
            if write_seq:
                seq_scr[pl.ds(row, B), :] = h_out.astype(jnp.bfloat16)
            return (h_out, c_out)

        h0 = jnp.zeros((B, H), jnp.float32)
        c0 = jnp.zeros((B, H), jnp.float32)
        h_final, _ = jax.lax.fori_loop(0, T, step, (h0, c0), unroll=True)

    # MultiOuts head fused into the same kernel (single tiny store); the final
    # hidden state arrives directly from the loop-carry register.
    logits_ref[...] = (jnp.dot(h_final.astype(jnp.bfloat16), ow_ref[...],
                               preferred_element_type=jnp.float32)
                       + ob_ref[...])


# ----------------------------------------------------------------------------
# Wrapper: one pallas_call, everything resident in VMEM (tiny shapes).
# ----------------------------------------------------------------------------
@jax.jit
def smiles_module_forward(smiles, lengths, params):
    """smiles: (T, B, input_dim) float32 (time-major), lengths: (B,) int32."""
    T, B, D = smiles.shape
    num_layers = len(params["lstm"])
    H = params["lstm"][0][1].shape[0]
    N = params["out_w"].shape[1]

    # Reshape only (free); the bf16 cast happens inside the kernel.
    x2d = smiles.reshape(T * B, D)
    len2d = lengths.astype(jnp.int32).reshape(B, 1)

    args = [x2d, len2d]
    in_specs = [pl.BlockSpec((T * B, D), lambda: (0, 0)),
                pl.BlockSpec((B, 1), lambda: (0, 0))]
    for (w_ih, w_hh, b) in params["lstm"]:
        args += [w_ih, w_hh, b]
        in_specs += [pl.BlockSpec(w_ih.shape, lambda: (0, 0)),
                     pl.BlockSpec(w_hh.shape, lambda: (0, 0)),
                     pl.BlockSpec(b.shape, lambda: (0, 0))]
    args += [params["out_w"], params["out_b"]]
    in_specs += [pl.BlockSpec(params["out_w"].shape, lambda: (0, 0)),
                 pl.BlockSpec(params["out_b"].shape, lambda: (0, 0))]

    kernel = functools.partial(_smiles_fused_kernel, num_layers, T, B, H)
    return pl.pallas_call(
        kernel,
        out_shape=jax.ShapeDtypeStruct((B, N), jnp.float32),
        in_specs=in_specs,
        out_specs=pl.BlockSpec((B, N), lambda: (0, 0)),
        scratch_shapes=[
            pltpu.VMEM((T * B, 4 * H), jnp.float32),   # hoisted gate pre-acts
            pltpu.VMEM((T * B, H), jnp.bfloat16),      # inter-layer sequence
        ],
    )(*args)


# ----------------------------------------------------------------------------
# Pure-JAX reference (same bf16 matmul precision) for verification.
# ----------------------------------------------------------------------------
def reference_forward(smiles, lengths, params):
    T, B, _ = smiles.shape
    x = smiles
    mask = (jnp.arange(T, dtype=jnp.int32)[:, None]
            < lengths[None, :]).astype(jnp.float32)[:, :, None]   # (T, B, 1)
    h = None
    for (w_ih, w_hh, b) in params["lstm"]:
        H = w_hh.shape[0]
        h = jnp.zeros((B, H), jnp.float32)
        c = jnp.zeros((B, H), jnp.float32)
        outs = []
        for t in range(T):
            gates = (jnp.dot(x[t].astype(jnp.bfloat16), w_ih,
                             preferred_element_type=jnp.float32)
                     + jnp.dot(h.astype(jnp.bfloat16), w_hh,
                               preferred_element_type=jnp.float32) + b)
            i = jax.nn.sigmoid(gates[:, 0 * H:1 * H])
            f = jax.nn.sigmoid(gates[:, 1 * H:2 * H])
            g = jnp.tanh(gates[:, 2 * H:3 * H])
            o = jax.nn.sigmoid(gates[:, 3 * H:4 * H])
            c_new = f * c + i * g
            h_new = o * jnp.tanh(c_new)
            m = mask[t]
            h = m * h_new + (1.0 - m) * h
            c = m * c_new + (1.0 - m) * c
            outs.append(h)
        x = jnp.stack(outs, axis=0)
    return (jnp.dot(h.astype(jnp.bfloat16), params["out_w"],
                    preferred_element_type=jnp.float32) + params["out_b"])


def init_params(key, input_dim, hidden_dim, num_layers, n_out):
    # Matmul weights stored in bf16 (MXU-native on v6e/v7x); biases in f32.
    # TODO(synk): PyTorch stores w_ih/w_hh as (4H, in)/(4H, H); transpose when
    #             porting real checkpoints.
    params = {"lstm": []}
    k = key
    bound = 1.0 / float(hidden_dim) ** 0.5
    in_dim = input_dim
    for _ in range(num_layers):
        k, k1, k2, k3 = jax.random.split(k, 4)
        w_ih = jax.random.uniform(k1, (in_dim, 4 * hidden_dim),
                                  jnp.float32, -bound, bound).astype(jnp.bfloat16)
        w_hh = jax.random.uniform(k2, (hidden_dim, 4 * hidden_dim),
                                  jnp.float32, -bound, bound).astype(jnp.bfloat16)
        # b = b_ih + b_hh folded into one bias row.
        b = jax.random.uniform(k3, (1, 4 * hidden_dim),
                               jnp.float32, -2 * bound, 2 * bound)
        params["lstm"].append((w_ih, w_hh, b))
        in_dim = hidden_dim
    k, k1, k2 = jax.random.split(k, 3)
    params["out_w"] = jax.random.uniform(k1, (hidden_dim, n_out),
                                         jnp.float32, -bound, bound).astype(jnp.bfloat16)
    params["out_b"] = jax.random.uniform(k2, (1, n_out),
                                         jnp.float32, -bound, bound)
    return params


if __name__ == "__main__":
    # Small synthetic config consistent with the module:
    #   lstm_sliding_window=2, len(smiles_alphabet)=16 -> input_dim=32
    #   lstm_hidden_dim=32, lstm_num_layers=2, n_out=3 targets
    T, B = 8, 8
    INPUT_DIM, HIDDEN_DIM, NUM_LAYERS, N_OUT = 32, 32, 2, 3

    key = jax.random.PRNGKey(0)
    k_x, k_len, k_p = jax.random.split(key, 3)

    smiles = jax.random.normal(k_x, (T, B, INPUT_DIM), jnp.float32)
    lengths = jax.random.randint(k_len, (B,), 1, T + 1, jnp.int32)
    params = init_params(k_p, INPUT_DIM, HIDDEN_DIM, NUM_LAYERS, N_OUT)

    logits = smiles_module_forward(smiles, lengths, params)
    jax.block_until_ready(logits)
    assert logits.shape == (B, N_OUT)

    ref = reference_forward(smiles, lengths, params)
    assert jnp.allclose(logits, ref, atol=5e-2, rtol=5e-2), (
        "max abs diff = %f" % float(jnp.max(jnp.abs(logits - ref))))
    print("KERNEL_OK")
</pallas_src>

<mosaic_0001>
module attributes {stable_mosaic.version = 11 : i64} {
  func.func @_smiles_fused_kernel(%arg0: memref<64x32xf32, #tpu.memory_space<vmem>>, %arg1: memref<8x1xi32, #tpu.memory_space<vmem>>, %arg2: memref<32x128xbf16, #tpu.memory_space<vmem>>, %arg3: memref<32x128xbf16, #tpu.memory_space<vmem>>, %arg4: memref<1x128xf32, #tpu.memory_space<vmem>>, %arg5: memref<32x128xbf16, #tpu.memory_space<vmem>>, %arg6: memref<32x128xbf16, #tpu.memory_space<vmem>>, %arg7: memref<1x128xf32, #tpu.memory_space<vmem>>, %arg8: memref<32x3xbf16, #tpu.memory_space<vmem>>, %arg9: memref<1x3xf32, #tpu.memory_space<vmem>>, %arg10: memref<8x3xf32, #tpu.memory_space<vmem>>, %arg11: memref<64x128xf32, #tpu.memory_space<vmem>>, %arg12: memref<64x32xbf16, #tpu.memory_space<vmem>>) attributes {dimension_semantics = [], scalar_prefetch = 0 : i64, scratch_operands = 2 : i64, tpu.core_type = #tpu.core_type<tc>} {
    %c0 = arith.constant 0 : index
    %c0_0 = arith.constant 0 : index
    %0 = vector.load %arg1[%c0, %c0_0] : memref<8x1xi32, #tpu.memory_space<vmem>>, vector<8x1xi32>
    %1 = tpu.iota {dimensions = array<i32: 1>} : vector<8x128xi32>
    %c64_i32 = arith.constant 64 : i32
    %2 = vector.broadcast %c64_i32 : i32 to vector<8x128xi32>
    %3 = arith.cmpi sge, %1, %2 : vector<8x128xi32>
    %c96_i32 = arith.constant 96 : i32
    %4 = vector.broadcast %c96_i32 : i32 to vector<8x128xi32>
    %5 = arith.cmpi slt, %1, %4 : vector<8x128xi32>
    %6 = arith.andi %3, %5 : vector<8x128xi1>
    %c0_1 = arith.constant 0 : index
    %c0_2 = arith.constant 0 : index
    %7 = vector.load %arg2[%c0_1, %c0_2] : memref<32x128xbf16, #tpu.memory_space<vmem>>, vector<32x128xbf16>
    %c0_3 = arith.constant 0 : index
    %c0_4 = arith.constant 0 : index
    %8 = vector.load %arg3[%c0_3, %c0_4] : memref<32x128xbf16, #tpu.memory_space<vmem>>, vector<32x128xbf16>
    %c0_5 = arith.constant 0 : index
    %c0_6 = arith.constant 0 : index
    %9 = vector.load %arg4[%c0_5, %c0_6] : memref<1x128xf32, #tpu.memory_space<vmem>>, vector<1x128xf32>
    %c0_7 = arith.constant 0 : index
    %c0_8 = arith.constant 0 : index
    %10 = vector.load %arg0[%c0_7, %c0_8] : memref<64x32xf32, #tpu.memory_space<vmem>>, vector<64x32xf32>
    %11 = arith.truncf %10 : vector<64x32xf32> to vector<64x32xbf16>
    %cst = arith.constant dense<0.000000e+00> : vector<64x128xf32>
    %12 = tpu.matmul %11, %7, %cst {dimension_numbers = #tpu.dot_dimension_numbers<[1], [0], [0], [1], [0, 0, 1, 1], [], []>} : vector<64x32xbf16>, vector<32x128xbf16>, vector<64x128xf32> -> vector<64x128xf32>
    %13 = vector.broadcast %9 : vector<1x128xf32> to vector<64x128xf32>
    %14 = arith.addf %12, %13 : vector<64x128xf32>
    %c0_9 = arith.constant 0 : index
    %c0_10 = arith.constant 0 : index
    %15 = vector.load %arg11[%c0_9, %c0_10] : memref<64x128xf32, #tpu.memory_space<vmem>>, vector<64x128xf32>
    tpu.vector_store %arg11[%c0_9, %c0_10], %14 {strides = array<i32>} : memref<64x128xf32, #tpu.memory_space<vmem>>, vector<64x128xf32>,
    %cst_11 = arith.constant 0.000000e+00 : f32
    %16 = vector.broadcast %cst_11 : f32 to vector<8x32xf32>
    %cst_12 = arith.constant 0.000000e+00 : f32
    %17 = vector.broadcast %cst_12 : f32 to vector<8x32xf32>
    %c0_i32 = arith.constant 0 : i32
    %c8_i32 = arith.constant 8 : i32
    %18 = arith.muli %c0_i32, %c8_i32 : i32
    %19 = tpu.assume_multiple %18, 8 : i32
    %20 = arith.index_cast %19 : i32 to index
    %c0_13 = arith.constant 0 : index
    %21 = vector.load %arg11[%20, %c0_13] : memref<64x128xf32, #tpu.memory_space<vmem>>, vector<8x128xf32>
    %22 = arith.truncf %16 : vector<8x32xf32> to vector<8x32xbf16>
    %cst_14 = arith.constant dense<0.000000e+00> : vector<8x128xf32>
    %23 = tpu.matmul %22, %8, %cst_14 {dimension_numbers = #tpu.dot_dimension_numbers<[1], [0], [0], [1], [0, 0, 1, 1], [], []>} : vector<8x32xbf16>, vector<32x128xbf16>, vector<8x128xf32> -> vector<8x128xf32>
    %24 = arith.addf %21, %23 : vector<8x128xf32>
    %cst_15 = arith.constant 5.000000e-01 : f32
    %25 = vector.broadcast %cst_15 : f32 to vector<8x128xf32>
    %26 = arith.mulf %25, %24 : vector<8x128xf32>
    %27 = arith.select %6, %24, %26 : vector<8x128xi1>, vector<8x128xf32>
    %28 = math.tanh %27 : vector<8x128xf32>
    %cst_16 = arith.constant 1.000000e+00 : f32
    %29 = vector.broadcast %cst_16 : f32 to vector<8x128xf32>
    %30 = arith.addf %28, %29 : vector<8x128xf32>
    %cst_17 = arith.constant 5.000000e-01 : f32
    %31 = vector.broadcast %cst_17 : f32 to vector<8x128xf32>
    %32 = arith.mulf %31, %30 : vector<8x128xf32>
    %33 = arith.select %6, %28, %32 : vector<8x128xi1>, vector<8x128xf32>
    %34 = vector.extract_strided_slice %33 {offsets = [0, 0], sizes = [8, 32], strides = [1, 1]} : vector<8x128xf32> to vector<8x32xf32>
    %35 = vector.extract_strided_slice %33 {offsets = [0, 32], sizes = [8, 32], strides = [1, 1]} : vector<8x128xf32> to vector<8x32xf32>
    %36 = vector.extract_strided_slice %33 {offsets = [0, 64], sizes = [8, 32], strides = [1, 1]} : vector<8x128xf32> to vector<8x32xf32>
    %37 = vector.extract_strided_slice %33 {offsets = [0, 96], sizes = [8, 32], strides = [1, 1]} : vector<8x128xf32> to vector<8x32xf32>
    %38 = arith.mulf %35, %17 : vector<8x32xf32>
    %39 = arith.mulf %34, %36 : vector<8x32xf32>
    %40 = arith.addf %38, %39 : vector<8x32xf32>
    %41 = math.tanh %40 : vector<8x32xf32>
    %42 = arith.mulf %37, %41 : vector<8x32xf32>
    %43 = vector.broadcast %c0_i32 : i32 to vector<8x1xi32>
    %44 = arith.cmpi slt, %43, %0 : vector<8x1xi32>
    %45 = vector.shape_cast %44 : vector<8x1xi1> to vector<8x1xi1>
    %46 = vector.broadcast %45 : vector<8x1xi1> to vector<8x32xi1>
    %47 = arith.select %46, %42, %16 : vector<8x32xi1>, vector<8x32xf32>
    %48 = vector.shape_cast %44 : vector<8x1xi1> to vector<8x1xi1>
    %49 = vector.broadcast %48 : vector<8x1xi1> to vector<8x32xi1>
    %50 = arith.select %49, %40, %17 : vector<8x32xi1>, vector<8x32xf32>
    %51 = arith.truncf %47 : vector<8x32xf32> to vector<8x32xbf16>
    %52 = arith.index_cast %19 : i32 to index
    %c0_18 = arith.constant 0 : index
    %53 = vector.load %arg12[%52, %c0_18] : memref<64x32xbf16, #tpu.memory_space<vmem>>, vector<8x32xbf16>
    tpu.vector_store %arg12[%52, %c0_18], %51 {strides = array<i32>} : memref<64x32xbf16, #tpu.memory_space<vmem>>, vector<8x32xbf16>,
    %c1_i32 = arith.constant 1 : i32
    %c8_i32_19 = arith.constant 8 : i32
    %54 = arith.muli %c1_i32, %c8_i32_19 : i32
    %55 = tpu.assume_multiple %54, 8 : i32
    %56 = arith.index_cast %55 : i32 to index
    %c0_20 = arith.constant 0 : index
    %57 = vector.load %arg11[%56, %c0_20] : memref<64x128xf32, #tpu.memory_space<vmem>>, vector<8x128xf32>
    %58 = arith.truncf %47 : vector<8x32xf32> to vector<8x32xbf16>
    %cst_21 = arith.constant dense<0.000000e+00> : vector<8x128xf32>
    %59 = tpu.matmul %58, %8, %cst_21 {dimension_numbers = #tpu.dot_dimension_numbers<[1], [0], [0], [1], [0, 0, 1, 1], [], []>} : vector<8x32xbf16>, vector<32x128xbf16>, vector<8x128xf32> -> vector<8x128xf32>
    %60 = arith.addf %57, %59 : vector<8x128xf32>
    %cst_22 = arith.constant 5.000000e-01 : f32
    %61 = vector.broadcast %cst_22 : f32 to vector<8x128xf32>
    %62 = arith.mulf %61, %60 : vector<8x128xf32>
    %63 = arith.select %6, %60, %62 : vector<8x128xi1>, vector<8x128xf32>
    %64 = math.tanh %63 : vector<8x128xf32>
    %cst_23 = arith.constant 1.000000e+00 : f32
    %65 = vector.broadcast %cst_23 : f32 to vector<8x128xf32>
    %66 = arith.addf %64, %65 : vector<8x128xf32>
    %cst_24 = arith.constant 5.000000e-01 : f32
    %67 = vector.broadcast %cst_24 : f32 to vector<8x128xf32>
    %68 = arith.mulf %67, %66 : vector<8x128xf32>
    %69 = arith.select %6, %64, %68 : vector<8x128xi1>, vector<8x128xf32>
    %70 = vector.extract_strided_slice %69 {offsets = [0, 0], sizes = [8, 32], strides = [1, 1]} : vector<8x128xf32> to vector<8x32xf32>
    %71 = vector.extract_strided_slice %69 {offsets = [0, 32], sizes = [8, 32], strides = [1, 1]} : vector<8x128xf32> to vector<8x32xf32>
    %72 = vector.extract_strided_slice %69 {offsets = [0, 64], sizes = [8, 32], strides = [1, 1]} : vector<8x128xf32> to vector<8x32xf32>
    %73 = vector.extract_strided_slice %69 {offsets = [0, 96], sizes = [8, 32], strides = [1, 1]} : vector<8x128xf32> to vector<8x32xf32>
    %74 = arith.mulf %71, %50 : vector<8x32xf32>
    %75 = arith.mulf %70, %72 : vector<8x32xf32>
    %76 = arith.addf %74, %75 : vector<8x32xf32>
    %77 = math.tanh %76 : vector<8x32xf32>
    %78 = arith.mulf %73, %77 : vector<8x32xf32>
    %79 = vector.broadcast %c1_i32 : i32 to vector<8x1xi32>
    %80 = arith.cmpi slt, %79, %0 : vector<8x1xi32>
    %81 = vector.shape_cast %80 : vector<8x1xi1> to vector<8x1xi1>
    %82 = vector.broadcast %81 : vector<8x1xi1> to vector<8x32xi1>
    %83 = arith.select %82, %78, %47 : vector<8x32xi1>, vector<8x32xf32>
    %84 = vector.shape_cast %80 : vector<8x1xi1> to vector<8x1xi1>
    %85 = vector.broadcast %84 : vector<8x1xi1> to vector<8x32xi1>
    %86 = arith.select %85, %76, %50 : vector<8x32xi1>, vector<8x32xf32>
    %87 = arith.truncf %83 : vector<8x32xf32> to vector<8x32xbf16>
    %88 = arith.index_cast %55 : i32 to index
    %c0_25 = arith.constant 0 : index
    %89 = vector.load %arg12[%88, %c0_25] : memref<64x32xbf16, #tpu.memory_space<vmem>>, vector<8x32xbf16>
    tpu.vector_store %arg12[%88, %c0_25], %87 {strides = array<i32>} : memref<64x32xbf16, #tpu.memory_space<vmem>>, vector<8x32xbf16>,
    %c2_i32 = arith.constant 2 : i32
    %c8_i32_26 = arith.constant 8 : i32
    %90 = arith.muli %c2_i32, %c8_i32_26 : i32
    %91 = tpu.assume_multiple %90, 8 : i32
    %92 = arith.index_cast %91 : i32 to index
    %c0_27 = arith.constant 0 : index
    %93 = vector.load %arg11[%92, %c0_27] : memref<64x128xf32, #tpu.memory_space<vmem>>, vector<8x128xf32>
    %94 = arith.truncf %83 : vector<8x32xf32> to vector<8x32xbf16>
    %cst_28 = arith.constant dense<0.000000e+00> : vector<8x128xf32>
    %95 = tpu.matmul %94, %8, %cst_28 {dimension_numbers = #tpu.dot_dimension_numbers<[1], [0], [0], [1], [0, 0, 1, 1], [], []>} : vector<8x32xbf16>, vector<32x128xbf16>, vector<8x128xf32> -> vector<8x128xf32>
    %96 = arith.addf %93, %95 : vector<8x128xf32>
    %cst_29 = arith.constant 5.000000e-01 : f32
    %97 = vector.broadcast %cst_29 : f32 to vector<8x128xf32>
    %98 = arith.mulf %97, %96 : vector<8x128xf32>
    %99 = arith.select %6, %96, %98 : vector<8x128xi1>, vector<8x128xf32>
    %100 = math.tanh %99 : vector<8x128xf32>
    %cst_30 = arith.constant 1.000000e+00 : f32
    %101 = vector.broadcast %cst_30 : f32 to vector<8x128xf32>
    %102 = arith.addf %100, %101 : vector<8x128xf32>
    %cst_31 = arith.constant 5.000000e-01 : f32
    %103 = vector.broadcast %cst_31 : f32 to vector<8x128xf32>
    %104 = arith.mulf %103, %102 : vector<8x128xf32>
    %105 = arith.select %6, %100, %104 : vector<8x128xi1>, vector<8x128xf32>
    %106 = vector.extract_strided_slice %105 {offsets = [0, 0], sizes = [8, 32], strides = [1, 1]} : vector<8x128xf32> to vector<8x32xf32>
    %107 = vector.extract_strided_slice %105 {offsets = [0, 32], sizes = [8, 32], strides = [1, 1]} : vector<8x128xf32> to vector<8x32xf32>
    %108 = vector.extract_strided_slice %105 {offsets = [0, 64], sizes = [8, 32], strides = [1, 1]} : vector<8x128xf32> to vector<8x32xf32>
    %109 = vector.extract_strided_slice %105 {offsets = [0, 96], sizes = [8, 32], strides = [1, 1]} : vector<8x128xf32> to vector<8x32xf32>
    %110 = arith.mulf %107, %86 : vector<8x32xf32>
    %111 = arith.mulf %106, %108 : vector<8x32xf32>
    %112 = arith.addf %110, %111 : vector<8x32xf32>
    %113 = math.tanh %112 : vector<8x32xf32>
    %114 = arith.mulf %109, %113 : vector<8x32xf32>
    %115 = vector.broadcast %c2_i32 : i32 to vector<8x1xi32>
    %116 = arith.cmpi slt, %115, %0 : vector<8x1xi32>
    %117 = vector.shape_cast %116 : vector<8x1xi1> to vector<8x1xi1>
    %118 = vector.broadcast %117 : vector<8x1xi1> to vector<8x32xi1>
    %119 = arith.select %118, %114, %83 : vector<8x32xi1>, vector<8x32xf32>
    %120 = vector.shape_cast %116 : vector<8x1xi1> to vector<8x1xi1>
    %121 = vector.broadcast %120 : vector<8x1xi1> to vector<8x32xi1>
    %122 = arith.select %121, %112, %86 : vector<8x32xi1>, vector<8x32xf32>
    %123 = arith.truncf %119 : vector<8x32xf32> to vector<8x32xbf16>
    %124 = arith.index_cast %91 : i32 to index
    %c0_32 = arith.constant 0 : index
    %125 = vector.load %arg12[%124, %c0_32] : memref<64x32xbf16, #tpu.memory_space<vmem>>, vector<8x32xbf16>
    tpu.vector_store %arg12[%124, %c0_32], %123 {strides = array<i32>} : memref<64x32xbf16, #tpu.memory_space<vmem>>, vector<8x32xbf16>,
    %c3_i32 = arith.constant 3 : i32
    %c8_i32_33 = arith.constant 8 : i32
    %126 = arith.muli %c3_i32, %c8_i32_33 : i32
    %127 = tpu.assume_multiple %126, 8 : i32
    %128 = arith.index_cast %127 : i32 to index
    %c0_34 = arith.constant 0 : index
    %129 = vector.load %arg11[%128, %c0_34] : memref<64x128xf32, #tpu.memory_space<vmem>>, vector<8x128xf32>
    %130 = arith.truncf %119 : vector<8x32xf32> to vector<8x32xbf16>
    %cst_35 = arith.constant dense<0.000000e+00> : vector<8x128xf32>
    %131 = tpu.matmul %130, %8, %cst_35 {dimension_numbers = #tpu.dot_dimension_numbers<[1], [0], [0], [1], [0, 0, 1, 1], [], []>} : vector<8x32xbf16>, vector<32x128xbf16>, vector<8x128xf32> -> vector<8x128xf32>
    %132 = arith.addf %129, %131 : vector<8x128xf32>
    %cst_36 = arith.constant 5.000000e-01 : f32
    %133 = vector.broadcast %cst_36 : f32 to vector<8x128xf32>
    %134 = arith.mulf %133, %132 : vector<8x128xf32>
    %135 = arith.select %6, %132, %134 : vector<8x128xi1>, vector<8x128xf32>
    %136 = math.tanh %135 : vector<8x128xf32>
    %cst_37 = arith.constant 1.000000e+00 : f32
    %137 = vector.broadcast %cst_37 : f32 to vector<8x128xf32>
    %138 = arith.addf %136, %137 : vector<8x128xf32>
    %cst_38 = arith.constant 5.000000e-01 : f32
    %139 = vector.broadcast %cst_38 : f32 to vector<8x128xf32>
    %140 = arith.mulf %139, %138 : vector<8x128xf32>
    %141 = arith.select %6, %136, %140 : vector<8x128xi1>, vector<8x128xf32>
    %142 = vector.extract_strided_slice %141 {offsets = [0, 0], sizes = [8, 32], strides = [1, 1]} : vector<8x128xf32> to vector<8x32xf32>
    %143 = vector.extract_strided_slice %141 {offsets = [0, 32], sizes = [8, 32], strides = [1, 1]} : vector<8x128xf32> to vector<8x32xf32>
    %144 = vector.extract_strided_slice %141 {offsets = [0, 64], sizes = [8, 32], strides = [1, 1]} : vector<8x128xf32> to vector<8x32xf32>
    %145 = vector.extract_strided_slice %141 {offsets = [0, 96], sizes = [8, 32], strides = [1, 1]} : vector<8x128xf32> to vector<8x32xf32>
    %146 = arith.mulf %143, %122 : vector<8x32xf32>
    %147 = arith.mulf %142, %144 : vector<8x32xf32>
    %148 = arith.addf %146, %147 : vector<8x32xf32>
    %149 = math.tanh %148 : vector<8x32xf32>
    %150 = arith.mulf %145, %149 : vector<8x32xf32>
    %151 = vector.broadcast %c3_i32 : i32 to vector<8x1xi32>
    %152 = arith.cmpi slt, %151, %0 : vector<8x1xi32>
    %153 = vector.shape_cast %152 : vector<8x1xi1> to vector<8x1xi1>
    %154 = vector.broadcast %153 : vector<8x1xi1> to vector<8x32xi1>
    %155 = arith.select %154, %150, %119 : vector<8x32xi1>, vector<8x32xf32>
    %156 = vector.shape_cast %152 : vector<8x1xi1> to vector<8x1xi1>
    %157 = vector.broadcast %156 : vector<8x1xi1> to vector<8x32xi1>
    %158 = arith.select %157, %148, %122 : vector<8x32xi1>, vector<8x32xf32>
    %159 = arith.truncf %155 : vector<8x32xf32> to vector<8x32xbf16>
    %160 = arith.index_cast %127 : i32 to index
    %c0_39 = arith.constant 0 : index
    %161 = vector.load %arg12[%160, %c0_39] : memref<64x32xbf16, #tpu.memory_space<vmem>>, vector<8x32xbf16>
    tpu.vector_store %arg12[%160, %c0_39], %159 {strides = array<i32>} : memref<64x32xbf16, #tpu.memory_space<vmem>>, vector<8x32xbf16>,
    %c4_i32 = arith.constant 4 : i32
    %c8_i32_40 = arith.constant 8 : i32
    %162 = arith.muli %c4_i32, %c8_i32_40 : i32
    %163 = tpu.assume_multiple %162, 8 : i32
    %164 = arith.index_cast %163 : i32 to index
    %c0_41 = arith.constant 0 : index
    %165 = vector.load %arg11[%164, %c0_41] : memref<64x128xf32, #tpu.memory_space<vmem>>, vector<8x128xf32>
    %166 = arith.truncf %155 : vector<8x32xf32> to vector<8x32xbf16>
    %cst_42 = arith.constant dense<0.000000e+00> : vector<8x128xf32>
    %167 = tpu.matmul %166, %8, %cst_42 {dimension_numbers = #tpu.dot_dimension_numbers<[1], [0], [0], [1], [0, 0, 1, 1], [], []>} : vector<8x32xbf16>, vector<32x128xbf16>, vector<8x128xf32> -> vector<8x128xf32>
    %168 = arith.addf %165, %167 : vector<8x128xf32>
    %cst_43 = arith.constant 5.000000e-01 : f32
    %169 = vector.broadcast %cst_43 : f32 to vector<8x128xf32>
    %170 = arith.mulf %169, %168 : vector<8x128xf32>
    %171 = arith.select %6, %168, %170 : vector<8x128xi1>, vector<8x128xf32>
    %172 = math.tanh %171 : vector<8x128xf32>
    %cst_44 = arith.constant 1.000000e+00 : f32
    %173 = vector.broadcast %cst_44 : f32 to vector<8x128xf32>
    %174 = arith.addf %172, %173 : vector<8x128xf32>
    %cst_45 = arith.constant 5.000000e-01 : f32
    %175 = vector.broadcast %cst_45 : f32 to vector<8x128xf32>
    %176 = arith.mulf %175, %174 : vector<8x128xf32>
    %177 = arith.select %6, %172, %176 : vector<8x128xi1>, vector<8x128xf32>
    %178 = vector.extract_strided_slice %177 {offsets = [0, 0], sizes = [8, 32], strides = [1, 1]} : vector<8x128xf32> to vector<8x32xf32>
    %179 = vector.extract_strided_slice %177 {offsets = [0, 32], sizes = [8, 32], strides = [1, 1]} : vector<8x128xf32> to vector<8x32xf32>
    %180 = vector.extract_strided_slice %177 {offsets = [0, 64], sizes = [8, 32], strides = [1, 1]} : vector<8x128xf32> to vector<8x32xf32>
    %181 = vector.extract_strided_slice %177 {offsets = [0, 96], sizes = [8, 32], strides = [1, 1]} : vector<8x128xf32> to vector<8x32xf32>
    %182 = arith.mulf %179, %158 : vector<8x32xf32>
    %183 = arith.mulf %178, %180 : vector<8x32xf32>
    %184 = arith.addf %182, %183 : vector<8x32xf32>
    %185 = math.tanh %184 : vector<8x32xf32>
    %186 = arith.mulf %181, %185 : vector<8x32xf32>
    %187 = vector.broadcast %c4_i32 : i32 to vector<8x1xi32>
    %188 = arith.cmpi slt, %187, %0 : vector<8x1xi32>
    %189 = vector.shape_cast %188 : vector<8x1xi1> to vector<8x1xi1>
    %190 = vector.broadcast %189 : vector<8x1xi1> to vector<8x32xi1>
    %191 = arith.select %190, %186, %155 : vector<8x32xi1>, vector<8x32xf32>
    %192 = vector.shape_cast %188 : vector<8x1xi1> to vector<8x1xi1>
    %193 = vector.broadcast %192 : vector<8x1xi1> to vector<8x32xi1>
    %194 = arith.select %193, %184, %158 : vector<8x32xi1>, vector<8x32xf32>
    %195 = arith.truncf %191 : vector<8x32xf32> to vector<8x32xbf16>
    %196 = arith.index_cast %163 : i32 to index
    %c0_46 = arith.constant 0 : index
    %197 = vector.load %arg12[%196, %c0_46] : memref<64x32xbf16, #tpu.memory_space<vmem>>, vector<8x32xbf16>
    tpu.vector_store %arg12[%196, %c0_46], %195 {strides = array<i32>} : memref<64x32xbf16, #tpu.memory_space<vmem>>, vector<8x32xbf16>,
    %c5_i32 = arith.constant 5 : i32
    %c8_i32_47 = arith.constant 8 : i32
    %198 = arith.muli %c5_i32, %c8_i32_47 : i32
    %199 = tpu.assume_multiple %198, 8 : i32
    %200 = arith.index_cast %199 : i32 to index
    %c0_48 = arith.constant 0 : index
    %201 = vector.load %arg11[%200, %c0_48] : memref<64x128xf32, #tpu.memory_space<vmem>>, vector<8x128xf32>
    %202 = arith.truncf %191 : vector<8x32xf32> to vector<8x32xbf16>
    %cst_49 = arith.constant dense<0.000000e+00> : vector<8x128xf32>
    %203 = tpu.matmul %202, %8, %cst_49 {dimension_numbers = #tpu.dot_dimension_numbers<[1], [0], [0], [1], [0, 0, 1, 1], [], []>} : vector<8x32xbf16>, vector<32x128xbf16>, vector<8x128xf32> -> vector<8x128xf32>
    %204 = arith.addf %201, %203 : vector<8x128xf32>
    %cst_50 = arith.constant 5.000000e-01 : f32
    %205 = vector.broadcast %cst_50 : f32 to vector<8x128xf32>
    %206 = arith.mulf %205, %204 : vector<8x128xf32>
    %207 = arith.select %6, %204, %206 : vector<8x128xi1>, vector<8x128xf32>
    %208 = math.tanh %207 : vector<8x128xf32>
    %cst_51 = arith.constant 1.000000e+00 : f32
    %209 = vector.broadcast %cst_51 : f32 to vector<8x128xf32>
    %210 = arith.addf %208, %209 : vector<8x128xf32>
    %cst_52 = arith.constant 5.000000e-01 : f32
    %211 = vector.broadcast %cst_52 : f32 to vector<8x128xf32>
    %212 = arith.mulf %211, %210 : vector<8x128xf32>
    %213 = arith.select %6, %208, %212 : vector<8x128xi1>, vector<8x128xf32>
    %214 = vector.extract_strided_slice %213 {offsets = [0, 0], sizes = [8, 32], strides = [1, 1]} : vector<8x128xf32> to vector<8x32xf32>
    %215 = vector.extract_strided_slice %213 {offsets = [0, 32], sizes = [8, 32], strides = [1, 1]} : vector<8x128xf32> to vector<8x32xf32>
    %216 = vector.extract_strided_slice %213 {offsets = [0, 64], sizes = [8, 32], strides = [1, 1]} : vector<8x128xf32> to vector<8x32xf32>
    %217 = vector.extract_strided_slice %213 {offsets = [0, 96], sizes = [8, 32], strides = [1, 1]} : vector<8x128xf32> to vector<8x32xf32>
    %218 = arith.mulf %215, %194 : vector<8x32xf32>
    %219 = arith.mulf %214, %216 : vector<8x32xf32>
    %220 = arith.addf %218, %219 : vector<8x32xf32>
    %221 = math.tanh %220 : vector<8x32xf32>
    %222 = arith.mulf %217, %221 : vector<8x32xf32>
    %223 = vector.broadcast %c5_i32 : i32 to vector<8x1xi32>
    %224 = arith.cmpi slt, %223, %0 : vector<8x1xi32>
    %225 = vector.shape_cast %224 : vector<8x1xi1> to vector<8x1xi1>
    %226 = vector.broadcast %225 : vector<8x1xi1> to vector<8x32xi1>
    %227 = arith.select %226, %222, %191 : vector<8x32xi1>, vector<8x32xf32>
    %228 = vector.shape_cast %224 : vector<8x1xi1> to vector<8x1xi1>
    %229 = vector.broadcast %228 : vector<8x1xi1> to vector<8x32xi1>
    %230 = arith.select %229, %220, %194 : vector<8x32xi1>, vector<8x32xf32>
    %231 = arith.truncf %227 : vector<8x32xf32> to vector<8x32xbf16>
    %232 = arith.index_cast %199 : i32 to index
    %c0_53 = arith.constant 0 : index
    %233 = vector.load %arg12[%232, %c0_53] : memref<64x32xbf16, #tpu.memory_space<vmem>>, vector<8x32xbf16>
    tpu.vector_store %arg12[%232, %c0_53], %231 {strides = array<i32>} : memref<64x32xbf16, #tpu.memory_space<vmem>>, vector<8x32xbf16>,
    %c6_i32 = arith.constant 6 : i32
    %c8_i32_54 = arith.constant 8 : i32
    %234 = arith.muli %c6_i32, %c8_i32_54 : i32
    %235 = tpu.assume_multiple %234, 8 : i32
    %236 = arith.index_cast %235 : i32 to index
    %c0_55 = arith.constant 0 : index
    %237 = vector.load %arg11[%236, %c0_55] : memref<64x128xf32, #tpu.memory_space<vmem>>, vector<8x128xf32>
    %238 = arith.truncf %227 : vector<8x32xf32> to vector<8x32xbf16>
    %cst_56 = arith.constant dense<0.000000e+00> : vector<8x128xf32>
    %239 = tpu.matmul %238, %8, %cst_56 {dimension_numbers = #tpu.dot_dimension_numbers<[1], [0], [0], [1], [0, 0, 1, 1], [], []>} : vector<8x32xbf16>, vector<32x128xbf16>, vector<8x128xf32> -> vector<8x128xf32>
    %240 = arith.addf %237, %239 : vector<8x128xf32>
    %cst_57 = arith.constant 5.000000e-01 : f32
    %241 = vector.broadcast %cst_57 : f32 to vector<8x128xf32>
    %242 = arith.mulf %241, %240 : vector<8x128xf32>
    %243 = arith.select %6, %240, %242 : vector<8x128xi1>, vector<8x128xf32>
    %244 = math.tanh %243 : vector<8x128xf32>
    %cst_58 = arith.constant 1.000000e+00 : f32
    %245 = vector.broadcast %cst_58 : f32 to vector<8x128xf32>
    %246 = arith.addf %244, %245 : vector<8x128xf32>
    %cst_59 = arith.constant 5.000000e-01 : f32
    %247 = vector.broadcast %cst_59 : f32 to vector<8x128xf32>
    %248 = arith.mulf %247, %246 : vector<8x128xf32>
    %249 = arith.select %6, %244, %248 : vector<8x128xi1>, vector<8x128xf32>
    %250 = vector.extract_strided_slice %249 {offsets = [0, 0], sizes = [8, 32], strides = [1, 1]} : vector<8x128xf32> to vector<8x32xf32>
    %251 = vector.extract_strided_slice %249 {offsets = [0, 32], sizes = [8, 32], strides = [1, 1]} : vector<8x128xf32> to vector<8x32xf32>
    %252 = vector.extract_strided_slice %249 {offsets = [0, 64], sizes = [8, 32], strides = [1, 1]} : vector<8x128xf32> to vector<8x32xf32>
    %253 = vector.extract_strided_slice %249 {offsets = [0, 96], sizes = [8, 32], strides = [1, 1]} : vector<8x128xf32> to vector<8x32xf32>
    %254 = arith.mulf %251, %230 : vector<8x32xf32>
    %255 = arith.mulf %250, %252 : vector<8x32xf32>
    %256 = arith.addf %254, %255 : vector<8x32xf32>
    %257 = math.tanh %256 : vector<8x32xf32>
    %258 = arith.mulf %253, %257 : vector<8x32xf32>
    %259 = vector.broadcast %c6_i32 : i32 to vector<8x1xi32>
    %260 = arith.cmpi slt, %259, %0 : vector<8x1xi32>
    %261 = vector.shape_cast %260 : vector<8x1xi1> to vector<8x1xi1>
    %262 = vector.broadcast %261 : vector<8x1xi1> to vector<8x32xi1>
    %263 = arith.select %262, %258, %227 : vector<8x32xi1>, vector<8x32xf32>
    %264 = vector.shape_cast %260 : vector<8x1xi1> to vector<8x1xi1>
    %265 = vector.broadcast %264 : vector<8x1xi1> to vector<8x32xi1>
    %266 = arith.select %265, %256, %230 : vector<8x32xi1>, vector<8x32xf32>
    %267 = arith.truncf %263 : vector<8x32xf32> to vector<8x32xbf16>
    %268 = arith.index_cast %235 : i32 to index
    %c0_60 = arith.constant 0 : index
    %269 = vector.load %arg12[%268, %c0_60] : memref<64x32xbf16, #tpu.memory_space<vmem>>, vector<8x32xbf16>
    tpu.vector_store %arg12[%268, %c0_60], %267 {strides = array<i32>} : memref<64x32xbf16, #tpu.memory_space<vmem>>, vector<8x32xbf16>,
    %c7_i32 = arith.constant 7 : i32
    %c8_i32_61 = arith.constant 8 : i32
    %270 = arith.muli %c7_i32, %c8_i32_61 : i32
    %271 = tpu.assume_multiple %270, 8 : i32
    %272 = arith.index_cast %271 : i32 to index
    %c0_62 = arith.constant 0 : index
    %273 = vector.load %arg11[%272, %c0_62] : memref<64x128xf32, #tpu.memory_space<vmem>>, vector<8x128xf32>
    %274 = arith.truncf %263 : vector<8x32xf32> to vector<8x32xbf16>
    %cst_63 = arith.constant dense<0.000000e+00> : vector<8x128xf32>
    %275 = tpu.matmul %274, %8, %cst_63 {dimension_numbers = #tpu.dot_dimension_numbers<[1], [0], [0], [1], [0, 0, 1, 1], [], []>} : vector<8x32xbf16>, vector<32x128xbf16>, vector<8x128xf32> -> vector<8x128xf32>
    %276 = arith.addf %273, %275 : vector<8x128xf32>
    %cst_64 = arith.constant 5.000000e-01 : f32
    %277 = vector.broadcast %cst_64 : f32 to vector<8x128xf32>
    %278 = arith.mulf %277, %276 : vector<8x128xf32>
    %279 = arith.select %6, %276, %278 : vector<8x128xi1>, vector<8x128xf32>
    %280 = math.tanh %279 : vector<8x128xf32>
    %cst_65 = arith.constant 1.000000e+00 : f32
    %281 = vector.broadcast %cst_65 : f32 to vector<8x128xf32>
    %282 = arith.addf %280, %281 : vector<8x128xf32>
    %cst_66 = arith.constant 5.000000e-01 : f32
    %283 = vector.broadcast %cst_66 : f32 to vector<8x128xf32>
    %284 = arith.mulf %283, %282 : vector<8x128xf32>
    %285 = arith.select %6, %280, %284 : vector<8x128xi1>, vector<8x128xf32>
    %286 = vector.extract_strided_slice %285 {offsets = [0, 0], sizes = [8, 32], strides = [1, 1]} : vector<8x128xf32> to vector<8x32xf32>
    %287 = vector.extract_strided_slice %285 {offsets = [0, 32], sizes = [8, 32], strides = [1, 1]} : vector<8x128xf32> to vector<8x32xf32>
    %288 = vector.extract_strided_slice %285 {offsets = [0, 64], sizes = [8, 32], strides = [1, 1]} : vector<8x128xf32> to vector<8x32xf32>
    %289 = vector.extract_strided_slice %285 {offsets = [0, 96], sizes = [8, 32], strides = [1, 1]} : vector<8x128xf32> to vector<8x32xf32>
    %290 = arith.mulf %287, %266 : vector<8x32xf32>
    %291 = arith.mulf %286, %288 : vector<8x32xf32>
    %292 = arith.addf %290, %291 : vector<8x32xf32>
    %293 = math.tanh %292 : vector<8x32xf32>
    %294 = arith.mulf %289, %293 : vector<8x32xf32>
    %295 = vector.broadcast %c7_i32 : i32 to vector<8x1xi32>
    %296 = arith.cmpi slt, %295, %0 : vector<8x1xi32>
    %297 = vector.shape_cast %296 : vector<8x1xi1> to vector<8x1xi1>
    %298 = vector.broadcast %297 : vector<8x1xi1> to vector<8x32xi1>
    %299 = arith.select %298, %294, %263 : vector<8x32xi1>, vector<8x32xf32>
    %300 = vector.shape_cast %296 : vector<8x1xi1> to vector<8x1xi1>
    %301 = vector.broadcast %300 : vector<8x1xi1> to vector<8x32xi1>
    %302 = arith.select %301, %292, %266 : vector<8x32xi1>, vector<8x32xf32>
    %303 = arith.truncf %299 : vector<8x32xf32> to vector<8x32xbf16>
    %304 = arith.index_cast %271 : i32 to index
    %c0_67 = arith.constant 0 : index
    %305 = vector.load %arg12[%304, %c0_67] : memref<64x32xbf16, #tpu.memory_space<vmem>>, vector<8x32xbf16>
    tpu.vector_store %arg12[%304, %c0_67], %303 {strides = array<i32>} : memref<64x32xbf16, #tpu.memory_space<vmem>>, vector<8x32xbf16>,
    %c8_i32_68 = arith.constant 8 : i32
    %c0_69 = arith.constant 0 : index
    %c0_70 = arith.constant 0 : index
    %306 = vector.load %arg5[%c0_69, %c0_70] : memref<32x128xbf16, #tpu.memory_space<vmem>>, vector<32x128xbf16>
    %c0_71 = arith.constant 0 : index
    %c0_72 = arith.constant 0 : index
    %307 = vector.load %arg6[%c0_71, %c0_72] : memref<32x128xbf16, #tpu.memory_space<vmem>>, vector<32x128xbf16>
    %c0_73 = arith.constant 0 : index
    %c0_74 = arith.constant 0 : index
    %308 = vector.load %arg7[%c0_73, %c0_74] : memref<1x128xf32, #tpu.memory_space<vmem>>, vector<1x128xf32>
    %c0_75 = arith.constant 0 : index
    %c0_76 = arith.constant 0 : index
    %309 = vector.load %arg12[%c0_75, %c0_76] : memref<64x32xbf16, #tpu.memory_space<vmem>>, vector<64x32xbf16>
    %cst_77 = arith.constant dense<0.000000e+00> : vector<64x128xf32>
    %310 = tpu.matmul %309, %306, %cst_77 {dimension_numbers = #tpu.dot_dimension_numbers<[1], [0], [0], [1], [0, 0, 1, 1], [], []>} : vector<64x32xbf16>, vector<32x128xbf16>, vector<64x128xf32> -> vector<64x128xf32>
    %311 = vector.broadcast %308 : vector<1x128xf32> to vector<64x128xf32>
    %312 = arith.addf %310, %311 : vector<64x128xf32>
    %c0_78 = arith.constant 0 : index
    %c0_79 = arith.constant 0 : index
    %313 = vector.load %arg11[%c0_78, %c0_79] : memref<64x128xf32, #tpu.memory_space<vmem>>, vector<64x128xf32>
    tpu.vector_store %arg11[%c0_78, %c0_79], %312 {strides = array<i32>} : memref<64x128xf32, #tpu.memory_space<vmem>>, vector<64x128xf32>,
    %cst_80 = arith.constant 0.000000e+00 : f32
    %314 = vector.broadcast %cst_80 : f32 to vector<8x32xf32>
    %cst_81 = arith.constant 0.000000e+00 : f32
    %315 = vector.broadcast %cst_81 : f32 to vector<8x32xf32>
    %c0_i32_82 = arith.constant 0 : i32
    %c8_i32_83 = arith.constant 8 : i32
    %316 = arith.muli %c0_i32_82, %c8_i32_83 : i32
    %317 = tpu.assume_multiple %316, 8 : i32
    %318 = arith.index_cast %317 : i32 to index
    %c0_84 = arith.constant 0 : index
    %319 = vector.load %arg11[%318, %c0_84] : memref<64x128xf32, #tpu.memory_space<vmem>>, vector<8x128xf32>
    %320 = arith.truncf %314 : vector<8x32xf32> to vector<8x32xbf16>
    %cst_85 = arith.constant dense<0.000000e+00> : vector<8x128xf32>
    %321 = tpu.matmul %320, %307, %cst_85 {dimension_numbers = #tpu.dot_dimension_numbers<[1], [0], [0], [1], [0, 0, 1, 1], [], []>} : vector<8x32xbf16>, vector<32x128xbf16>, vector<8x128xf32> -> vector<8x128xf32>
    %322 = arith.addf %319, %321 : vector<8x128xf32>
    %cst_86 = arith.constant 5.000000e-01 : f32
    %323 = vector.broadcast %cst_86 : f32 to vector<8x128xf32>
    %324 = arith.mulf %323, %322 : vector<8x128xf32>
    %325 = arith.select %6, %322, %324 : vector<8x128xi1>, vector<8x128xf32>
    %326 = math.tanh %325 : vector<8x128xf32>
    %cst_87 = arith.constant 1.000000e+00 : f32
    %327 = vector.broadcast %cst_87 : f32 to vector<8x128xf32>
    %328 = arith.addf %326, %327 : vector<8x128xf32>
    %cst_88 = arith.constant 5.000000e-01 : f32
    %329 = vector.broadcast %cst_88 : f32 to vector<8x128xf32>
    %330 = arith.mulf %329, %328 : vector<8x128xf32>
    %331 = arith.select %6, %326, %330 : vector<8x128xi1>, vector<8x128xf32>
    %332 = vector.extract_strided_slice %331 {offsets = [0, 0], sizes = [8, 32], strides = [1, 1]} : vector<8x128xf32> to vector<8x32xf32>
    %333 = vector.extract_strided_slice %331 {offsets = [0, 32], sizes = [8, 32], strides = [1, 1]} : vector<8x128xf32> to vector<8x32xf32>
    %334 = vector.extract_strided_slice %331 {offsets = [0, 64], sizes = [8, 32], strides = [1, 1]} : vector<8x128xf32> to vector<8x32xf32>
    %335 = vector.extract_strided_slice %331 {offsets = [0, 96], sizes = [8, 32], strides = [1, 1]} : vector<8x128xf32> to vector<8x32xf32>
    %336 = arith.mulf %333, %315 : vector<8x32xf32>
    %337 = arith.mulf %332, %334 : vector<8x32xf32>
    %338 = arith.addf %336, %337 : vector<8x32xf32>
    %339 = math.tanh %338 : vector<8x32xf32>
    %340 = arith.mulf %335, %339 : vector<8x32xf32>
    %341 = vector.broadcast %c0_i32_82 : i32 to vector<8x1xi32>
    %342 = arith.cmpi slt, %341, %0 : vector<8x1xi32>
    %343 = vector.shape_cast %342 : vector<8x1xi1> to vector<8x1xi1>
    %344 = vector.broadcast %343 : vector<8x1xi1> to vector<8x32xi1>
    %345 = arith.select %344, %340, %314 : vector<8x32xi1>, vector<8x32xf32>
    %346 = vector.shape_cast %342 : vector<8x1xi1> to vector<8x1xi1>
    %347 = vector.broadcast %346 : vector<8x1xi1> to vector<8x32xi1>
    %348 = arith.select %347, %338, %315 : vector<8x32xi1>, vector<8x32xf32>
    %c1_i32_89 = arith.constant 1 : i32
    %c8_i32_90 = arith.constant 8 : i32
    %349 = arith.muli %c1_i32_89, %c8_i32_90 : i32
    %350 = tpu.assume_multiple %349, 8 : i32
    %351 = arith.index_cast %350 : i32 to index
    %c0_91 = arith.constant 0 : index
    %352 = vector.load %arg11[%351, %c0_91] : memref<64x128xf32, #tpu.memory_space<vmem>>, vector<8x128xf32>
    %353 = arith.truncf %345 : vector<8x32xf32> to vector<8x32xbf16>
    %cst_92 = arith.constant dense<0.000000e+00> : vector<8x128xf32>
    %354 = tpu.matmul %353, %307, %cst_92 {dimension_numbers = #tpu.dot_dimension_numbers<[1], [0], [0], [1], [0, 0, 1, 1], [], []>} : vector<8x32xbf16>, vector<32x128xbf16>, vector<8x128xf32> -> vector<8x128xf32>
    %355 = arith.addf %352, %354 : vector<8x128xf32>
    %cst_93 = arith.constant 5.000000e-01 : f32
    %356 = vector.broadcast %cst_93 : f32 to vector<8x128xf32>
    %357 = arith.mulf %356, %355 : vector<8x128xf32>
    %358 = arith.select %6, %355, %357 : vector<8x128xi1>, vector<8x128xf32>
    %359 = math.tanh %358 : vector<8x128xf32>
    %cst_94 = arith.constant 1.000000e+00 : f32
    %360 = vector.broadcast %cst_94 : f32 to vector<8x128xf32>
    %361 = arith.addf %359, %360 : vector<8x128xf32>
    %cst_95 = arith.constant 5.000000e-01 : f32
    %362 = vector.broadcast %cst_95 : f32 to vector<8x128xf32>
    %363 = arith.mulf %362, %361 : vector<8x128xf32>
    %364 = arith.select %6, %359, %363 : vector<8x128xi1>, vector<8x128xf32>
    %365 = vector.extract_strided_slice %364 {offsets = [0, 0], sizes = [8, 32], strides = [1, 1]} : vector<8x128xf32> to vector<8x32xf32>
    %366 = vector.extract_strided_slice %364 {offsets = [0, 32], sizes = [8, 32], strides = [1, 1]} : vector<8x128xf32> to vector<8x32xf32>
    %367 = vector.extract_strided_slice %364 {offsets = [0, 64], sizes = [8, 32], strides = [1, 1]} : vector<8x128xf32> to vector<8x32xf32>
    %368 = vector.extract_strided_slice %364 {offsets = [0, 96], sizes = [8, 32], strides = [1, 1]} : vector<8x128xf32> to vector<8x32xf32>
    %369 = arith.mulf %366, %348 : vector<8x32xf32>
    %370 = arith.mulf %365, %367 : vector<8x32xf32>
    %371 = arith.addf %369, %370 : vector<8x32xf32>
    %372 = math.tanh %371 : vector<8x32xf32>
    %373 = arith.mulf %368, %372 : vector<8x32xf32>
    %374 = vector.broadcast %c1_i32_89 : i32 to vector<8x1xi32>
    %375 = arith.cmpi slt, %374, %0 : vector<8x1xi32>
    %376 = vector.shape_cast %375 : vector<8x1xi1> to vector<8x1xi1>
    %377 = vector.broadcast %376 : vector<8x1xi1> to vector<8x32xi1>
    %378 = arith.select %377, %373, %345 : vector<8x32xi1>, vector<8x32xf32>
    %379 = vector.shape_cast %375 : vector<8x1xi1> to vector<8x1xi1>
    %380 = vector.broadcast %379 : vector<8x1xi1> to vector<8x32xi1>
    %381 = arith.select %380, %371, %348 : vector<8x32xi1>, vector<8x32xf32>
    %c2_i32_96 = arith.constant 2 : i32
    %c8_i32_97 = arith.constant 8 : i32
    %382 = arith.muli %c2_i32_96, %c8_i32_97 : i32
    %383 = tpu.assume_multiple %382, 8 : i32
    %384 = arith.index_cast %383 : i32 to index
    %c0_98 = arith.constant 0 : index
    %385 = vector.load %arg11[%384, %c0_98] : memref<64x128xf32, #tpu.memory_space<vmem>>, vector<8x128xf32>
    %386 = arith.truncf %378 : vector<8x32xf32> to vector<8x32xbf16>
    %cst_99 = arith.constant dense<0.000000e+00> : vector<8x128xf32>
    %387 = tpu.matmul %386, %307, %cst_99 {dimension_numbers = #tpu.dot_dimension_numbers<[1], [0], [0], [1], [0, 0, 1, 1], [], []>} : vector<8x32xbf16>, vector<32x128xbf16>, vector<8x128xf32> -> vector<8x128xf32>
    %388 = arith.addf %385, %387 : vector<8x128xf32>
    %cst_100 = arith.constant 5.000000e-01 : f32
    %389 = vector.broadcast %cst_100 : f32 to vector<8x128xf32>
    %390 = arith.mulf %389, %388 : vector<8x128xf32>
    %391 = arith.select %6, %388, %390 : vector<8x128xi1>, vector<8x128xf32>
    %392 = math.tanh %391 : vector<8x128xf32>
    %cst_101 = arith.constant 1.000000e+00 : f32
    %393 = vector.broadcast %cst_101 : f32 to vector<8x128xf32>
    %394 = arith.addf %392, %393 : vector<8x128xf32>
    %cst_102 = arith.constant 5.000000e-01 : f32
    %395 = vector.broadcast %cst_102 : f32 to vector<8x128xf32>
    %396 = arith.mulf %395, %394 : vector<8x128xf32>
    %397 = arith.select %6, %392, %396 : vector<8x128xi1>, vector<8x128xf32>
    %398 = vector.extract_strided_slice %397 {offsets = [0, 0], sizes = [8, 32], strides = [1, 1]} : vector<8x128xf32> to vector<8x32xf32>
    %399 = vector.extract_strided_slice %397 {offsets = [0, 32], sizes = [8, 32], strides = [1, 1]} : vector<8x128xf32> to vector<8x32xf32>
    %400 = vector.extract_strided_slice %397 {offsets = [0, 64], sizes = [8, 32], strides = [1, 1]} : vector<8x128xf32> to vector<8x32xf32>
    %401 = vector.extract_strided_slice %397 {offsets = [0, 96], sizes = [8, 32], strides = [1, 1]} : vector<8x128xf32> to vector<8x32xf32>
    %402 = arith.mulf %399, %381 : vector<8x32xf32>
    %403 = arith.mulf %398, %400 : vector<8x32xf32>
    %404 = arith.addf %402, %403 : vector<8x32xf32>
    %405 = math.tanh %404 : vector<8x32xf32>
    %406 = arith.mulf %401, %405 : vector<8x32xf32>
    %407 = vector.broadcast %c2_i32_96 : i32 to vector<8x1xi32>
    %408 = arith.cmpi slt, %407, %0 : vector<8x1xi32>
    %409 = vector.shape_cast %408 : vector<8x1xi1> to vector<8x1xi1>
    %410 = vector.broadcast %409 : vector<8x1xi1> to vector<8x32xi1>
    %411 = arith.select %410, %406, %378 : vector<8x32xi1>, vector<8x32xf32>
    %412 = vector.shape_cast %408 : vector<8x1xi1> to vector<8x1xi1>
    %413 = vector.broadcast %412 : vector<8x1xi1> to vector<8x32xi1>
    %414 = arith.select %413, %404, %381 : vector<8x32xi1>, vector<8x32xf32>
    %c3_i32_103 = arith.constant 3 : i32
    %c8_i32_104 = arith.constant 8 : i32
    %415 = arith.muli %c3_i32_103, %c8_i32_104 : i32
    %416 = tpu.assume_multiple %415, 8 : i32
    %417 = arith.index_cast %416 : i32 to index
    %c0_105 = arith.constant 0 : index
    %418 = vector.load %arg11[%417, %c0_105] : memref<64x128xf32, #tpu.memory_space<vmem>>, vector<8x128xf32>
    %419 = arith.truncf %411 : vector<8x32xf32> to vector<8x32xbf16>
    %cst_106 = arith.constant dense<0.000000e+00> : vector<8x128xf32>
    %420 = tpu.matmul %419, %307, %cst_106 {dimension_numbers = #tpu.dot_dimension_numbers<[1], [0], [0], [1], [0, 0, 1, 1], [], []>} : vector<8x32xbf16>, vector<32x128xbf16>, vector<8x128xf32> -> vector<8x128xf32>
    %421 = arith.addf %418, %420 : vector<8x128xf32>
    %cst_107 = arith.constant 5.000000e-01 : f32
    %422 = vector.broadcast %cst_107 : f32 to vector<8x128xf32>
    %423 = arith.mulf %422, %421 : vector<8x128xf32>
    %424 = arith.select %6, %421, %423 : vector<8x128xi1>, vector<8x128xf32>
    %425 = math.tanh %424 : vector<8x128xf32>
    %cst_108 = arith.constant 1.000000e+00 : f32
    %426 = vector.broadcast %cst_108 : f32 to vector<8x128xf32>
    %427 = arith.addf %425, %426 : vector<8x128xf32>
    %cst_109 = arith.constant 5.000000e-01 : f32
    %428 = vector.broadcast %cst_109 : f32 to vector<8x128xf32>
    %429 = arith.mulf %428, %427 : vector<8x128xf32>
    %430 = arith.select %6, %425, %429 : vector<8x128xi1>, vector<8x128xf32>
    %431 = vector.extract_strided_slice %430 {offsets = [0, 0], sizes = [8, 32], strides = [1, 1]} : vector<8x128xf32> to vector<8x32xf32>
    %432 = vector.extract_strided_slice %430 {offsets = [0, 32], sizes = [8, 32], strides = [1, 1]} : vector<8x128xf32> to vector<8x32xf32>
    %433 = vector.extract_strided_slice %430 {offsets = [0, 64], sizes = [8, 32], strides = [1, 1]} : vector<8x128xf32> to vector<8x32xf32>
    %434 = vector.extract_strided_slice %430 {offsets = [0, 96], sizes = [8, 32], strides = [1, 1]} : vector<8x128xf32> to vector<8x32xf32>
    %435 = arith.mulf %432, %414 : vector<8x32xf32>
    %436 = arith.mulf %431, %433 : vector<8x32xf32>
    %437 = arith.addf %435, %436 : vector<8x32xf32>
    %438 = math.tanh %437 : vector<8x32xf32>
    %439 = arith.mulf %434, %438 : vector<8x32xf32>
    %440 = vector.broadcast %c3_i32_103 : i32 to vector<8x1xi32>
    %441 = arith.cmpi slt, %440, %0 : vector<8x1xi32>
    %442 = vector.shape_cast %441 : vector<8x1xi1> to vector<8x1xi1>
    %443 = vector.broadcast %442 : vector<8x1xi1> to vector<8x32xi1>
    %444 = arith.select %443, %439, %411 : vector<8x32xi1>, vector<8x32xf32>
    %445 = vector.shape_cast %441 : vector<8x1xi1> to vector<8x1xi1>
    %446 = vector.broadcast %445 : vector<8x1xi1> to vector<8x32xi1>
    %447 = arith.select %446, %437, %414 : vector<8x32xi1>, vector<8x32xf32>
    %c4_i32_110 = arith.constant 4 : i32
    %c8_i32_111 = arith.constant 8 : i32
    %448 = arith.muli %c4_i32_110, %c8_i32_111 : i32
    %449 = tpu.assume_multiple %448, 8 : i32
    %450 = arith.index_cast %449 : i32 to index
    %c0_112 = arith.constant 0 : index
    %451 = vector.load %arg11[%450, %c0_112] : memref<64x128xf32, #tpu.memory_space<vmem>>, vector<8x128xf32>
    %452 = arith.truncf %444 : vector<8x32xf32> to vector<8x32xbf16>
    %cst_113 = arith.constant dense<0.000000e+00> : vector<8x128xf32>
    %453 = tpu.matmul %452, %307, %cst_113 {dimension_numbers = #tpu.dot_dimension_numbers<[1], [0], [0], [1], [0, 0, 1, 1], [], []>} : vector<8x32xbf16>, vector<32x128xbf16>, vector<8x128xf32> -> vector<8x128xf32>
    %454 = arith.addf %451, %453 : vector<8x128xf32>
    %cst_114 = arith.constant 5.000000e-01 : f32
    %455 = vector.broadcast %cst_114 : f32 to vector<8x128xf32>
    %456 = arith.mulf %455, %454 : vector<8x128xf32>
    %457 = arith.select %6, %454, %456 : vector<8x128xi1>, vector<8x128xf32>
    %458 = math.tanh %457 : vector<8x128xf32>
    %cst_115 = arith.constant 1.000000e+00 : f32
    %459 = vector.broadcast %cst_115 : f32 to vector<8x128xf32>
    %460 = arith.addf %458, %459 : vector<8x128xf32>
    %cst_116 = arith.constant 5.000000e-01 : f32
    %461 = vector.broadcast %cst_116 : f32 to vector<8x128xf32>
    %462 = arith.mulf %461, %460 : vector<8x128xf32>
    %463 = arith.select %6, %458, %462 : vector<8x128xi1>, vector<8x128xf32>
    %464 = vector.extract_strided_slice %463 {offsets = [0, 0], sizes = [8, 32], strides = [1, 1]} : vector<8x128xf32> to vector<8x32xf32>
    %465 = vector.extract_strided_slice %463 {offsets = [0, 32], sizes = [8, 32], strides = [1, 1]} : vector<8x128xf32> to vector<8x32xf32>
    %466 = vector.extract_strided_slice %463 {offsets = [0, 64], sizes = [8, 32], strides = [1, 1]} : vector<8x128xf32> to vector<8x32xf32>
    %467 = vector.extract_strided_slice %463 {offsets = [0, 96], sizes = [8, 32], strides = [1, 1]} : vector<8x128xf32> to vector<8x32xf32>
    %468 = arith.mulf %465, %447 : vector<8x32xf32>
    %469 = arith.mulf %464, %466 : vector<8x32xf32>
    %470 = arith.addf %468, %469 : vector<8x32xf32>
    %471 = math.tanh %470 : vector<8x32xf32>
    %472 = arith.mulf %467, %471 : vector<8x32xf32>
    %473 = vector.broadcast %c4_i32_110 : i32 to vector<8x1xi32>
    %474 = arith.cmpi slt, %473, %0 : vector<8x1xi32>
    %475 = vector.shape_cast %474 : vector<8x1xi1> to vector<8x1xi1>
    %476 = vector.broadcast %475 : vector<8x1xi1> to vector<8x32xi1>
    %477 = arith.select %476, %472, %444 : vector<8x32xi1>, vector<8x32xf32>
    %478 = vector.shape_cast %474 : vector<8x1xi1> to vector<8x1xi1>
    %479 = vector.broadcast %478 : vector<8x1xi1> to vector<8x32xi1>
    %480 = arith.select %479, %470, %447 : vector<8x32xi1>, vector<8x32xf32>
    %c5_i32_117 = arith.constant 5 : i32
    %c8_i32_118 = arith.constant 8 : i32
    %481 = arith.muli %c5_i32_117, %c8_i32_118 : i32
    %482 = tpu.assume_multiple %481, 8 : i32
    %483 = arith.index_cast %482 : i32 to index
    %c0_119 = arith.constant 0 : index
    %484 = vector.load %arg11[%483, %c0_119] : memref<64x128xf32, #tpu.memory_space<vmem>>, vector<8x128xf32>
    %485 = arith.truncf %477 : vector<8x32xf32> to vector<8x32xbf16>
    %cst_120 = arith.constant dense<0.000000e+00> : vector<8x128xf32>
    %486 = tpu.matmul %485, %307, %cst_120 {dimension_numbers = #tpu.dot_dimension_numbers<[1], [0], [0], [1], [0, 0, 1, 1], [], []>} : vector<8x32xbf16>, vector<32x128xbf16>, vector<8x128xf32> -> vector<8x128xf32>
    %487 = arith.addf %484, %486 : vector<8x128xf32>
    %cst_121 = arith.constant 5.000000e-01 : f32
    %488 = vector.broadcast %cst_121 : f32 to vector<8x128xf32>
    %489 = arith.mulf %488, %487 : vector<8x128xf32>
    %490 = arith.select %6, %487, %489 : vector<8x128xi1>, vector<8x128xf32>
    %491 = math.tanh %490 : vector<8x128xf32>
    %cst_122 = arith.constant 1.000000e+00 : f32
    %492 = vector.broadcast %cst_122 : f32 to vector<8x128xf32>
    %493 = arith.addf %491, %492 : vector<8x128xf32>
    %cst_123 = arith.constant 5.000000e-01 : f32
    %494 = vector.broadcast %cst_123 : f32 to vector<8x128xf32>
    %495 = arith.mulf %494, %493 : vector<8x128xf32>
    %496 = arith.select %6, %491, %495 : vector<8x128xi1>, vector<8x128xf32>
    %497 = vector.extract_strided_slice %496 {offsets = [0, 0], sizes = [8, 32], strides = [1, 1]} : vector<8x128xf32> to vector<8x32xf32>
    %498 = vector.extract_strided_slice %496 {offsets = [0, 32], sizes = [8, 32], strides = [1, 1]} : vector<8x128xf32> to vector<8x32xf32>
    %499 = vector.extract_strided_slice %496 {offsets = [0, 64], sizes = [8, 32], strides = [1, 1]} : vector<8x128xf32> to vector<8x32xf32>
    %500 = vector.extract_strided_slice %496 {offsets = [0, 96], sizes = [8, 32], strides = [1, 1]} : vector<8x128xf32> to vector<8x32xf32>
    %501 = arith.mulf %498, %480 : vector<8x32xf32>
    %502 = arith.mulf %497, %499 : vector<8x32xf32>
    %503 = arith.addf %501, %502 : vector<8x32xf32>
    %504 = math.tanh %503 : vector<8x32xf32>
    %505 = arith.mulf %500, %504 : vector<8x32xf32>
    %506 = vector.broadcast %c5_i32_117 : i32 to vector<8x1xi32>
    %507 = arith.cmpi slt, %506, %0 : vector<8x1xi32>
    %508 = vector.shape_cast %507 : vector<8x1xi1> to vector<8x1xi1>
    %509 = vector.broadcast %508 : vector<8x1xi1> to vector<8x32xi1>
    %510 = arith.select %509, %505, %477 : vector<8x32xi1>, vector<8x32xf32>
    %511 = vector.shape_cast %507 : vector<8x1xi1> to vector<8x1xi1>
    %512 = vector.broadcast %511 : vector<8x1xi1> to vector<8x32xi1>
    %513 = arith.select %512, %503, %480 : vector<8x32xi1>, vector<8x32xf32>
    %c6_i32_124 = arith.constant 6 : i32
    %c8_i32_125 = arith.constant 8 : i32
    %514 = arith.muli %c6_i32_124, %c8_i32_125 : i32
    %515 = tpu.assume_multiple %514, 8 : i32
    %516 = arith.index_cast %515 : i32 to index
    %c0_126 = arith.constant 0 : index
    %517 = vector.load %arg11[%516, %c0_126] : memref<64x128xf32, #tpu.memory_space<vmem>>, vector<8x128xf32>
    %518 = arith.truncf %510 : vector<8x32xf32> to vector<8x32xbf16>
    %cst_127 = arith.constant dense<0.000000e+00> : vector<8x128xf32>
    %519 = tpu.matmul %518, %307, %cst_127 {dimension_numbers = #tpu.dot_dimension_numbers<[1], [0], [0], [1], [0, 0, 1, 1], [], []>} : vector<8x32xbf16>, vector<32x128xbf16>, vector<8x128xf32> -> vector<8x128xf32>
    %520 = arith.addf %517, %519 : vector<8x128xf32>
    %cst_128 = arith.constant 5.000000e-01 : f32
    %521 = vector.broadcast %cst_128 : f32 to vector<8x128xf32>
    %522 = arith.mulf %521, %520 : vector<8x128xf32>
    %523 = arith.select %6, %520, %522 : vector<8x128xi1>, vector<8x128xf32>
    %524 = math.tanh %523 : vector<8x128xf32>
    %cst_129 = arith.constant 1.000000e+00 : f32
    %525 = vector.broadcast %cst_129 : f32 to vector<8x128xf32>
    %526 = arith.addf %524, %525 : vector<8x128xf32>
    %cst_130 = arith.constant 5.000000e-01 : f32
    %527 = vector.broadcast %cst_130 : f32 to vector<8x128xf32>
    %528 = arith.mulf %527, %526 : vector<8x128xf32>
    %529 = arith.select %6, %524, %528 : vector<8x128xi1>, vector<8x128xf32>
    %530 = vector.extract_strided_slice %529 {offsets = [0, 0], sizes = [8, 32], strides = [1, 1]} : vector<8x128xf32> to vector<8x32xf32>
    %531 = vector.extract_strided_slice %529 {offsets = [0, 32], sizes = [8, 32], strides = [1, 1]} : vector<8x128xf32> to vector<8x32xf32>
    %532 = vector.extract_strided_slice %529 {offsets = [0, 64], sizes = [8, 32], strides = [1, 1]} : vector<8x128xf32> to vector<8x32xf32>
    %533 = vector.extract_strided_slice %529 {offsets = [0, 96], sizes = [8, 32], strides = [1, 1]} : vector<8x128xf32> to vector<8x32xf32>
    %534 = arith.mulf %531, %513 : vector<8x32xf32>
    %535 = arith.mulf %530, %532 : vector<8x32xf32>
    %536 = arith.addf %534, %535 : vector<8x32xf32>
    %537 = math.tanh %536 : vector<8x32xf32>
    %538 = arith.mulf %533, %537 : vector<8x32xf32>
    %539 = vector.broadcast %c6_i32_124 : i32 to vector<8x1xi32>
    %540 = arith.cmpi slt, %539, %0 : vector<8x1xi32>
    %541 = vector.shape_cast %540 : vector<8x1xi1> to vector<8x1xi1>
    %542 = vector.broadcast %541 : vector<8x1xi1> to vector<8x32xi1>
    %543 = arith.select %542, %538, %510 : vector<8x32xi1>, vector<8x32xf32>
    %544 = vector.shape_cast %540 : vector<8x1xi1> to vector<8x1xi1>
    %545 = vector.broadcast %544 : vector<8x1xi1> to vector<8x32xi1>
    %546 = arith.select %545, %536, %513 : vector<8x32xi1>, vector<8x32xf32>
    %c7_i32_131 = arith.constant 7 : i32
    %c8_i32_132 = arith.constant 8 : i32
    %547 = arith.muli %c7_i32_131, %c8_i32_132 : i32
    %548 = tpu.assume_multiple %547, 8 : i32
    %549 = arith.index_cast %548 : i32 to index
    %c0_133 = arith.constant 0 : index
    %550 = vector.load %arg11[%549, %c0_133] : memref<64x128xf32, #tpu.memory_space<vmem>>, vector<8x128xf32>
    %551 = arith.truncf %543 : vector<8x32xf32> to vector<8x32xbf16>
    %cst_134 = arith.constant dense<0.000000e+00> : vector<8x128xf32>
    %552 = tpu.matmul %551, %307, %cst_134 {dimension_numbers = #tpu.dot_dimension_numbers<[1], [0], [0], [1], [0, 0, 1, 1], [], []>} : vector<8x32xbf16>, vector<32x128xbf16>, vector<8x128xf32> -> vector<8x128xf32>
    %553 = arith.addf %550, %552 : vector<8x128xf32>
    %cst_135 = arith.constant 5.000000e-01 : f32
    %554 = vector.broadcast %cst_135 : f32 to vector<8x128xf32>
    %555 = arith.mulf %554, %553 : vector<8x128xf32>
    %556 = arith.select %6, %553, %555 : vector<8x128xi1>, vector<8x128xf32>
    %557 = math.tanh %556 : vector<8x128xf32>
    %cst_136 = arith.constant 1.000000e+00 : f32
    %558 = vector.broadcast %cst_136 : f32 to vector<8x128xf32>
    %559 = arith.addf %557, %558 : vector<8x128xf32>
    %cst_137 = arith.constant 5.000000e-01 : f32
    %560 = vector.broadcast %cst_137 : f32 to vector<8x128xf32>
    %561 = arith.mulf %560, %559 : vector<8x128xf32>
    %562 = arith.select %6, %557, %561 : vector<8x128xi1>, vector<8x128xf32>
    %563 = vector.extract_strided_slice %562 {offsets = [0, 0], sizes = [8, 32], strides = [1, 1]} : vector<8x128xf32> to vector<8x32xf32>
    %564 = vector.extract_strided_slice %562 {offsets = [0, 32], sizes = [8, 32], strides = [1, 1]} : vector<8x128xf32> to vector<8x32xf32>
    %565 = vector.extract_strided_slice %562 {offsets = [0, 64], sizes = [8, 32], strides = [1, 1]} : vector<8x128xf32> to vector<8x32xf32>
    %566 = vector.extract_strided_slice %562 {offsets = [0, 96], sizes = [8, 32], strides = [1, 1]} : vector<8x128xf32> to vector<8x32xf32>
    %567 = arith.mulf %564, %546 : vector<8x32xf32>
    %568 = arith.mulf %563, %565 : vector<8x32xf32>
    %569 = arith.addf %567, %568 : vector<8x32xf32>
    %570 = math.tanh %569 : vector<8x32xf32>
    %571 = arith.mulf %566, %570 : vector<8x32xf32>
    %572 = vector.broadcast %c7_i32_131 : i32 to vector<8x1xi32>
    %573 = arith.cmpi slt, %572, %0 : vector<8x1xi32>
    %574 = vector.shape_cast %573 : vector<8x1xi1> to vector<8x1xi1>
    %575 = vector.broadcast %574 : vector<8x1xi1> to vector<8x32xi1>
    %576 = arith.select %575, %571, %543 : vector<8x32xi1>, vector<8x32xf32>
    %577 = vector.shape_cast %573 : vector<8x1xi1> to vector<8x1xi1>
    %578 = vector.broadcast %577 : vector<8x1xi1> to vector<8x32xi1>
    %579 = arith.select %578, %569, %546 : vector<8x32xi1>, vector<8x32xf32>
    %c8_i32_138 = arith.constant 8 : i32
    %580 = arith.truncf %576 : vector<8x32xf32> to vector<8x32xbf16>
    %c0_139 = arith.constant 0 : index
    %c0_140 = arith.constant 0 : index
    %581 = vector.load %arg8[%c0_139, %c0_140] : memref<32x3xbf16, #tpu.memory_space<vmem>>, vector<32x3xbf16>
    %cst_141 = arith.constant dense<0.000000e+00> : vector<8x3xf32>
    %582 = tpu.matmul %580, %581, %cst_141 {dimension_numbers = #tpu.dot_dimension_numbers<[1], [0], [0], [1], [0, 0, 1, 1], [], []>} : vector<8x32xbf16>, vector<32x3xbf16>, vector<8x3xf32> -> vector<8x3xf32>
    %c0_142 = arith.constant 0 : index
    %c0_143 = arith.constant 0 : index
    %583 = vector.load %arg9[%c0_142, %c0_143] : memref<1x3xf32, #tpu.memory_space<vmem>>, vector<1x3xf32>
    %584 = vector.broadcast %583 : vector<1x3xf32> to vector<8x3xf32>
    %585 = arith.addf %582, %584 : vector<8x3xf32>
    %c0_144 = arith.constant 0 : index
    %c0_145 = arith.constant 0 : index
    %586 = vector.load %arg10[%c0_144, %c0_145] : memref<8x3xf32, #tpu.memory_space<vmem>>, vector<8x3xf32>
    tpu.vector_store %arg10[%c0_144, %c0_145], %585 {strides = array<i32>} : memref<8x3xf32, #tpu.memory_space<vmem>>, vector<8x3xf32>,
    return
  }
}

</mosaic_0001>

<bundles_post_ra>
// kernel: smiles_module_forward.1
= control target key start
LH: loop header
LB: loop body
LE: loop exit
PB: predicated region body
PF: predicated region fallthrough
CT: control target
= control target key end

     0   :  { %15 = vsyncpa [#allocation5], 0  ;;  %s2766_s0 = inlined_call_operand.hbm [shape: f32[64,32], index: 0, kind: input, shape index: {}]   ;;  %s2767_s1 = inlined_call_operand.vmem [shape: s32[8,1], index: 1, kind: input, shape index: {}]   ;;  %s2768_s2 = inlined_call_operand.vmem [shape: bf16[32,128], index: 2, kind: input, shape index: {}]   ;;  %s2769_s3 = inlined_call_operand.vmem [shape: bf16[32,128], index: 3, kind: input, shape index: {}]   ;;  %s2770_s4 = inlined_call_operand.vmem [shape: f32[1,128], index: 4, kind: input, shape index: {}]   ;;  %s2771_s5 = inlined_call_operand.hbm [shape: bf16[32,128], index: 5, kind: input, shape index: {}]   ;;  %s2772_s6 = inlined_call_operand.hbm [shape: bf16[32,128], index: 6, kind: input, shape index: {}]   ;;  %s2773_s7 = inlined_call_operand.vmem [shape: f32[1,128], index: 7, kind: input, shape index: {}]   ;;  %s2774_s8 = inlined_call_operand.vmem [shape: bf16[32,3], index: 8, kind: input, shape index: {}]   ;;  %s2775_s9 = inlined_call_operand.vmem [shape: f32[1,3], index: 9, kind: input, shape index: {}]   ;;  %s2776_s10 = inlined_call_operand.vmem [shape: f32[8,3], index: 10, kind: output, shape index: {}]  }
   0x1   :  { %16 = vsyncpa [#allocation7], 0  ;;  %s2168_s13 = smov [#allocation6]  }
   0x2   :  { %s42_s14 = sshll.u32 %s2168_s13, 4  ;;  %s43_s14 = int_to_ptr.vmem [resolvable:$true] %s42_s14 }
   0x3   :  { %s2112_s15 = scalar_lea.vmem %s43_s14, 256  ;;  %p2117_p1 = scmp.lt.s32.totalorder %s43_s14, %s43_s14 }
   0x4   :  { %p2113_p0 = scmp.ne.s32.totalorder %s43_s14, %s2112_s15  ;;  %p2118_p2 = scmp.lt.s32.totalorder %s2112_s15, %s2112_s15 }
   0x6   :  { %p2119_p3 = por %p2118_p2, %p2117_p1 }
   0x8   :  { %p2120_p4 = pnand %p2119_p3, %p2113_p0 }
   0xa   :  { %2123 = shalt.err (!%p2120_p4)
}
   0xb   :  { %s2169_s16 = smov 64   ;;  %s2170_s17 = smov 4  }
   0xc   :  { %48 = dma.hbm_to_vmem [thread:$0]  %s2771_s5, 256, %s43_s14, [#allocation7], %s2169_s16, %s2169_s16, %s2170_s17  }
   0xd   :  { %s2171_s20 = smov [#allocation4]  }
   0xe   :  { %s22_s21 = sshll.u32 %s2171_s20, 4  ;;  %s23_s21 = int_to_ptr.vmem [resolvable:$true] %s22_s21 }
   0xf   :  { %s2132_s22 = scalar_lea.vmem %s23_s21, 1024  ;;  %p2137_p6 = scmp.lt.s32.totalorder %s23_s21, %s23_s21 }
  0x10   :  { %p2133_p5 = scmp.ne.s32.totalorder %s23_s21, %s2132_s22  ;;  %p2138_p7 = scmp.lt.s32.totalorder %s2132_s22, %s2132_s22 }
  0x12   :  { %p2139_p8 = por %p2138_p7, %p2137_p6 }
  0x14   :  { %p2140_p9 = pnand %p2139_p8, %p2133_p5 }
  0x16   :  { %2143 = shalt.err (!%p2140_p9)
}
  0x17   :  { %s2172_s23 = smov 128   ;;  %s2173_s24 = smov 8  }
  0x18   :  { %28 = dma.hbm_to_vmem [thread:$0]  %s2766_s0, 1024, %s23_s21, [#allocation5], %s2172_s23, %s2172_s23, %s2173_s24  }
  0x19   :  { %s2174_s27 = smov [#allocation8]  }
  0x1a   :  { %s54_s28 = sshll.u32 %s2174_s27, 4  ;;  %s55_s28 = int_to_ptr.vmem [resolvable:$true] %s54_s28 }
  0x1b   :  { %s2152_s5 = scalar_lea.vmem %s55_s28, 256  ;;  %p2157_p11 = scmp.lt.s32.totalorder %s55_s28, %s55_s28 }
  0x1c   :  { %p2153_p10 = scmp.ne.s32.totalorder %s55_s28, %s2152_s5  ;;  %p2158_p12 = scmp.lt.s32.totalorder %s2152_s5, %s2152_s5 }
  0x1e   :  { %p2159_p13 = por %p2158_p12, %p2157_p11 }
  0x20   :  { %p2160_p0 = pnand %p2159_p13, %p2153_p10 }
  0x22   :  { %2163 = shalt.err (!%p2160_p0)
}
  0x23   :  { %60 = dma.hbm_to_vmem [thread:$0]  %s2772_s6, 256, %s55_s28, [#allocation7], %s2169_s16, %s2169_s16, %s2170_s17  }
  0x24   :  { %2164 = dma.done.wait [#allocation5], 1024  }
  0x25   :  { %2165 = vsyncadd [#allocation5], 4294966272 }
  0x26   :  { %2166 = dma.done.wait [#allocation7], 512  }
  0x27   :  { %2167 = vsyncadd [#allocation7], 4294966784  ;;  %v2175_v0 = vmov 0.0   ;;  %vm2176_vm0 = vmmov 0   ;;  %v2177_v1 = vmov 0   ;;  %v2026_v2 = vld [vmem:[%s2768_s2 + $0x8] sm:$0xff]   ;;  %v78_v14 = vlaneseq }
  0x28   :  { %1865 = vmatprep.subr.bf16.mxu1 %v2175_v0  ;;  %1869 = vmatprep.mubr.msk.bf16.mxu1 %vm2176_vm0, %v2175_v0  ;;  %v2258_v3 = vld [vmem:[%s2769_s3 + $0x8] sm:$0xff]   ;;  %v2028_v4 = vld [vmem:[%s2768_s2] sm:$0xff]   ;;  %v94_v8 = vld [vmem:[#allocation4 + $0x10] sm:$0xff]  ;;  %vm122_vm1 = vcmask 261120  }
  0x29   :  { %2024 = vset.pattern.permute.xlu1 %v2177_v1  ;;  %2025 = vset.pattern.permute.xlu0 %v2177_v1  ;;  %v2267_v5 = vld [vmem:[%s2769_s3] sm:$0xff]   ;;  %v93_v7 = vld [vmem:[#allocation4 + $0x8] sm:$0xff]  ;;  %v95_v10 = vld [vmem:[#allocation4 + $0x18] sm:$0xff]  ;;  %v79_v15 = vand.u32 127, %v78_v14 }
  0x2a   :  { %1853 = vmatprep.subr.bf16.mxu0 %v2026_v2  ;;  %1866 = vmatpush3.bf16.msra.mxu1 %v2258_v3  ;;  %v92_v6 = vld [vmem:[#allocation4] sm:$0xff]  ;;  %v101_v11 = vpack.c.bf16 %v95_v10, %v94_v8 }
  0x2b   :  { %1854 = vmatpush3.bf16.msra.mxu0 %v2026_v2  ;;  %1867 = vmatprep.subr.bf16.mxu1 %v2175_v0  ;;  %v100_v9 = vpack.c.bf16 %v93_v7, %v92_v6  ;;  %v2289_v12 = vld [vmem:[%s2767_s1] sm:$0xff]  ;;  %vm80_vm3 = vcmp.ge.s32.totalorder %v79_v15, 64  ;;  %vm81_vm4 = vcmp.lt.s32.totalorder %v79_v15, 96  ;;  %s2178_s1 = smov 32   ;;  %v97_v6 = vld [vmem:[#allocation4 + $0x28] sm:$0xff]  ;;  %v98_v7 = vld [vmem:[#allocation4 + $0x30] sm:$0xff] }
  0x2c   :  { %1855 = vmatprep.subr.bf16.mxu0 %v2028_v4  ;;  %vm288_vm2 = vcmp.gt.s32.totalorder %v2289_v12, 0  ;;  %v2298_v18 = vld [vmem:[%s2770_s4] ss:$0 sm:$0xff]  ;;  %vm2301_vm5 = vmand %vm80_vm3, %vm81_vm4  ;;  %vm376_vm7 = vcmp.gt.s32.totalorder %v2289_v12, 1  ;;  %vm464_vm9 = vcmp.gt.s32.totalorder %v2289_v12, 2  ;;  %vm552_vm11 = vcmp.gt.s32.totalorder %v2289_v12, 3 }
  0x2d   :  { %1857 = vmatprep.mubr.msk.bf16.mxu0 %vm122_vm1, %v100_v9  ;;  %v289_v13 = vsel %vm288_vm2, 1, %v2177_v1  ;;  %v377_v58 = vsel %vm376_vm7, 1, %v2177_v1  ;;  %v99_v9 = vld [vmem:[#allocation4 + $0x38] sm:$0xff]  ;;  %vm640_vm13 = vcmp.gt.s32.totalorder %v2289_v12, 4  ;;  %vm728_vm15 = vcmp.gt.s32.totalorder %v2289_v12, 5  ;;  %v2039_v24 = vld [vmem:[%s2774_s8] sm:$0xff]  }
  0x2e   :  { %1868 = vmatpush3.bf16.msra.mxu1 %v2267_v5  ;;  %291 = vperm.xlu1 %2024, %v289_v13   ;;  %v103_v10 = vpack.c.bf16 %v99_v9, %v98_v7  ;;  %vm816_vm3 = vcmp.gt.s32.totalorder %v2289_v12, 6  ;;  %vm303_vm4 = vcmask 257024  }
  0x2f   :  { %1856 = vmatpush3.bf16.msra.mxu0 %v2028_v4  ;;  %1873 = vmatprep.subr.bf16.mxu1 %v2175_v0  ;;  %v96_v4 = vld [vmem:[#allocation4 + $0x20] sm:$0xff] }
  0x30   :  { %1881 = vmatprep.subr.bf16.mxu0 %v2175_v0  ;;  %v102_v8 = vpack.c.bf16 %v97_v6, %v96_v4 }
  0x31   :  { %1870 = vmatmul.mubr.bf16.vlgmr.msra.gmra.mxu1 %v2177_v1 }
  0x32   :  { %1858 = vmatmul.mubr.msk.bf16.vlgmr.msra.gmra.mxu0 %vm122_vm1, %v101_v11  ;;  %1874 = vmatpush3.bf16.msra.mxu1 %v2258_v3 }
  0x33   :  { %1877 = vmatprep.mubr.msk.bf16.mxu1 %vm2176_vm0, %v2175_v0  ;;  %1875 = vmatprep.subr.bf16.mxu1 %v2175_v0 }
  0x34   :  { %1882 = vmatpush3.bf16.msra.mxu0 %v2258_v3  ;;  %1861 = vmatprep.mubr.msk.bf16.mxu0 %vm122_vm1, %v102_v8 }
  0x35   :  { %1883 = vmatprep.subr.bf16.mxu0 %v2175_v0 }
  0x36   :  { %1876 = vmatpush3.bf16.msra.mxu1 %v2267_v5 }
  0x37   :  { %1889 = vmatprep.subr.bf16.mxu1 %v2175_v0 }
  0x38   :  { %1884 = vmatpush3.bf16.msra.mxu0 %v2267_v5 }
  0x39   :  { %1897 = vmatprep.subr.bf16.mxu0 %v2175_v0 }
  0x3a   :  { %1862 = vmatmul.mubr.msk.bf16.gmra.mxu0 %vm122_vm1, %v103_v10 }
  0x3b   :  { %1885 = vmatprep.mubr.msk.bf16.mxu0 %vm2176_vm0, %v2175_v0 }
  0xa9   :  { %v2312_v38 = vpop.permute.xlu1 %291 }
  0xaa   :  { %vm293_vm6 = vcmp.eq.s32.totalorder %v2312_v38, 1 }
  0xf1   :  { %v258_v16 = vpop.f32.mrf.mxu1 }
  0xf2   :  { %v2293_v17 = vpop.f32.mrf.mxu0 }
  0xf3   :  { %v1871_v19 = vpop.f32.mrf.mxu1 }
  0xf4   :  { %v169_v20 = vpop.f32.mrf.mxu0 }
  0xf5   :  { %v170_v21 = vadd.f32 %v2298_v18, %v169_v20  ;;  %v261_v22 = vpop.f32.mrf.mxu1 }
  0xf6   :  { %v2328_v44 = vpop.f32.mrf.mxu0 }
  0xf7   :  { %v264_v23 = vadd.f32 %v258_v16, %v170_v21  ;;  %v1872_v25 = vpop.f32.mrf.mxu1 }
  0xf8   :  { %v172_v45 = vpop.f32.mrf.mxu0 }
  0xf9   :  { %v265_v26 = vmul.f32 0.5, %v264_v23  ;;  %v173_v46 = vadd.f32 %v2298_v18, %v172_v45 }
  0xfa   :  { %v2362_v21 = vpop.f32.mrf.mxu0 }
  0xfb   :  { %v266_v27 = vsel %vm2301_vm5, %v264_v23, %v265_v26  ;;  %v178_v26 = vadd.f32 %v2293_v17, %v2298_v18  ;;  %v465_v17 = vsel %vm464_vm9, 1, %v2177_v1  ;;  %vm904_vm9 = vcmp.gt.s32.totalorder %v2289_v12, 7 }
  0xfc   :  { %2040 = vtanh.f32 %v266_v27  ;;  %v2364_v22 = vpop.f32.mrf.mxu0 }
  0xfe   :  { %v2366_v23 = vpop.f32.mrf.mxu0 }
 0x100   :  { %v2368_v25 = vpop.f32.mrf.mxu0 }
 0x109   :  { %v2041_v28 = vpop.eup %2040 }
 0x10a   :  { %v268_v29 = vadd.f32 1.0, %v2041_v28 }
 0x10c   :  { %v269_v30 = vmul.f32 0.5, %v268_v29 }
 0x10e   :  { %v270_v31 = vsel %vm2301_vm5, %v2041_v28, %v269_v30 }
 0x10f   :  { %273 = vrot.lane.b32.xlu0 %v270_v31, %s2169_s16  ;;  %v271_v34 = vmul.f32 0.0, %v270_v31 }
 0x181   :  { %v274_v32 = vpop.permute.xlu0 %273 }
 0x182   :  { %v276_v33 = vmul.f32 %v274_v32, %v270_v31 }
 0x184   :  { %278 = vrot.lane.b32.xlu0 %v276_v33, %s2178_s1 }
 0x1f6   :  { %v279_v35 = vpop.permute.xlu0 %278 }
 0x1f7   :  { %v281_v36 = vadd.f32 %v279_v35, %v271_v34 }
 0x1f9   :  { %2042 = vtanh.f32 %v281_v36  ;;  %v295_v61 = vsel %vm293_vm6, %v281_v36, 0.0 }
 0x206   :  { %v2043_v37 = vpop.eup %2042 }
 0x207   :  { %284 = vrot.lane.b32.xlu1 %v2043_v37, %s2169_s16 }
 0x279   :  { %v285_v39 = vpop.permute.xlu1 %284 }
 0x27a   :  { %v287_v40 = vmul.f32 %v285_v39, %v270_v31 }
 0x27c   :  { %v294_v41 = vsel %vm293_vm6, %v287_v40, 0.0 }
 0x27d   :  { %v2317_v42 = vpack.c.bf16 %v294_v41, %v294_v41 }
 0x27f   :  { %307 = vrot.lane.b32.xlu0 %v2317_v42, %s2178_s1 }
 0x2f1   :  { %v308_v43 = vpop.permute.xlu0 %307 }
 0x2f2   :  { %1878 = vmatmul.mubr.msk.bf16.vlgmr.msra.gmra.mxu1 %vm122_vm1, %v308_v43 }
 0x2f3   :  { %1890 = vmatpush3.bf16.msra.mxu1 %v2258_v3  ;;  %1893 = vmatprep.mubr.msk.bf16.mxu1 %vm2176_vm0, %v2175_v0 }
 0x2f4   :  { %1891 = vmatprep.subr.bf16.mxu1 %v2175_v0 }
 0x2f7   :  { %1892 = vmatpush3.bf16.msra.mxu1 %v2267_v5 }
 0x2f8   :  { %1905 = vmatprep.subr.bf16.mxu1 %v2175_v0 }
 0x3b2   :  { %v346_v47 = vpop.f32.mrf.mxu1 }
 0x3b3   :  { %v352_v48 = vadd.f32 %v346_v47, %v173_v46 }
 0x3b4   :  { %v1879_v49 = vpop.f32.mrf.mxu1 }
 0x3b5   :  { %v353_v50 = vmul.f32 0.5, %v352_v48 }
 0x3b6   :  { %v349_v51 = vpop.f32.mrf.mxu1 }
 0x3b7   :  { %v354_v52 = vsel %vm2301_vm5, %v352_v48, %v353_v50 }
 0x3b8   :  { %2044 = vtanh.f32 %v354_v52  ;;  %v1880_v53 = vpop.f32.mrf.mxu1 }
 0x3c5   :  { %v2045_v54 = vpop.eup %2044 }
 0x3c6   :  { %v356_v55 = vadd.f32 1.0, %v2045_v54 }
 0x3c8   :  { %v357_v56 = vmul.f32 0.5, %v356_v55 }
 0x3ca   :  { %v358_v57 = vsel %vm2301_vm5, %v2045_v54, %v357_v56  ;;  %v181_v54 = vadd.f32 %v2328_v44, %v2298_v18  ;;  %v553_v44 = vsel %vm552_vm11, 1, %v2177_v1 }
 0x3cb   :  { %361 = vrot.lane.b32.xlu1 %v358_v57, %s2169_s16  ;;  %v359_v62 = vmul.f32 %v358_v57, %v295_v61 }
 0x3cf   :  { %379 = vperm.xlu1 %2024, %v377_v58  }
 0x43d   :  { %v362_v59 = vpop.permute.xlu1 %361 }
 0x43e   :  { %v364_v60 = vmul.f32 %v362_v59, %v358_v57 }
 0x440   :  { %366 = vrot.lane.b32.xlu0 %v364_v60, %s2178_s1 }
 0x44a   :  { %v2346_v13 = vpop.permute.xlu1 %379 }
 0x44b   :  { %vm381_vm8 = vcmp.eq.s32.totalorder %v2346_v13, 1 }
 0x4b2   :  { %v367_v63 = vpop.permute.xlu0 %366 }
 0x4b3   :  { %v369_v2 = vadd.f32 %v367_v63, %v359_v62 }
 0x4b5   :  { %2046 = vtanh.f32 %v369_v2 }
 0x4c2   :  { %v2047_v11 = vpop.eup %2046 }
 0x4c3   :  { %372 = vrot.lane.b32.xlu0 %v2047_v11, %s2169_s16 }
 0x535   :  { %v373_v14 = vpop.permute.xlu0 %372 }
 0x536   :  { %v375_v15 = vmul.f32 %v373_v14, %v358_v57 }
 0x538   :  { %v382_v16 = vsel %vm381_vm8, %v375_v15, %v294_v41  ;;  %v383_v41 = vsel %vm381_vm8, %v369_v2, %v295_v61 }
 0x539   :  { %v2351_v19 = vpack.c.bf16 %v382_v16, %v382_v16 }
 0x53b   :  { %395 = vrot.lane.b32.xlu1 %v2351_v19, %s2178_s1 }
 0x5ad   :  { %v396_v20 = vpop.permute.xlu1 %395 }
 0x5ae   :  { %1886 = vmatmul.mubr.msk.bf16.vlgmr.msra.gmra.mxu0 %vm122_vm1, %v396_v20 }
 0x5af   :  { %1898 = vmatpush3.bf16.msra.mxu0 %v2258_v3  ;;  %1901 = vmatprep.mubr.msk.bf16.mxu0 %vm2176_vm0, %v2175_v0 }
 0x5b0   :  { %1899 = vmatprep.subr.bf16.mxu0 %v2175_v0 }
 0x5b3   :  { %1900 = vmatpush3.bf16.msra.mxu0 %v2267_v5 }
 0x5b4   :  { %1913 = vmatprep.subr.bf16.mxu0 %v2175_v0 }
 0x66e   :  { %v434_v27 = vpop.f32.mrf.mxu0 }
 0x66f   :  { %v440_v28 = vadd.f32 %v434_v27, %v178_v26 }
 0x670   :  { %v1887_v29 = vpop.f32.mrf.mxu0 }
 0x671   :  { %v441_v30 = vmul.f32 0.5, %v440_v28  ;;  %v186_v29 = vadd.f32 %v2298_v18, %v2364_v22  ;;  %v641_v22 = vsel %vm640_vm13, 1, %v2177_v1 }
 0x672   :  { %v437_v31 = vpop.f32.mrf.mxu0 }
 0x673   :  { %v442_v32 = vsel %vm2301_vm5, %v440_v28, %v441_v30 }
 0x674   :  { %2048 = vtanh.f32 %v442_v32  ;;  %v1888_v33 = vpop.f32.mrf.mxu0 }
 0x681   :  { %v2049_v34 = vpop.eup %2048 }
 0x682   :  { %v444_v35 = vadd.f32 1.0, %v2049_v34 }
 0x684   :  { %v445_v36 = vmul.f32 0.5, %v444_v35 }
 0x686   :  { %v446_v37 = vsel %vm2301_vm5, %v2049_v34, %v445_v36 }
 0x687   :  { %449 = vrot.lane.b32.xlu0 %v446_v37, %s2169_s16  ;;  %v447_v43 = vmul.f32 %v446_v37, %v383_v41 }
 0x68b   :  { %467 = vperm.xlu0 %2025, %v465_v17  }
 0x6f9   :  { %v450_v39 = vpop.permute.xlu0 %449 }
 0x6fa   :  { %v452_v40 = vmul.f32 %v450_v39, %v446_v37 }
 0x6fc   :  { %454 = vrot.lane.b32.xlu1 %v452_v40, %s2178_s1 }
 0x706   :  { %v2383_v48 = vpop.permute.xlu0 %467 }
 0x707   :  { %vm469_vm10 = vcmp.eq.s32.totalorder %v2383_v48, 1 }
 0x76e   :  { %v455_v45 = vpop.permute.xlu1 %454 }
 0x76f   :  { %v457_v46 = vadd.f32 %v455_v45, %v447_v43 }
 0x771   :  { %2050 = vtanh.f32 %v457_v46  ;;  %v471_v8 = vsel %vm469_vm10, %v457_v46, %v383_v41 }
 0x77e   :  { %v2051_v47 = vpop.eup %2050 }
 0x77f   :  { %460 = vrot.lane.b32.xlu1 %v2051_v47, %s2169_s16 }
 0x7f1   :  { %v461_v49 = vpop.permute.xlu1 %460 }
 0x7f2   :  { %v463_v50 = vmul.f32 %v461_v49, %v446_v37 }
 0x7f4   :  { %v470_v51 = vsel %vm469_vm10, %v463_v50, %v382_v16 }
 0x7f5   :  { %v2388_v52 = vpack.c.bf16 %v470_v51, %v470_v51 }
 0x7f7   :  { %483 = vrot.lane.b32.xlu1 %v2388_v52, %s2178_s1 }
 0x869   :  { %v484_v53 = vpop.permute.xlu1 %483 }
 0x86a   :  { %1894 = vmatmul.mubr.msk.bf16.vlgmr.msra.gmra.mxu1 %vm122_vm1, %v484_v53 }
 0x86b   :  { %1906 = vmatpush3.bf16.msra.mxu1 %v2258_v3  ;;  %1909 = vmatprep.mubr.msk.bf16.mxu1 %vm2176_vm0, %v2175_v0 }
 0x86c   :  { %1907 = vmatprep.subr.bf16.mxu1 %v2175_v0 }
 0x86f   :  { %1908 = vmatpush3.bf16.msra.mxu1 %v2267_v5 }
 0x870   :  { %1921 = vmatprep.subr.bf16.mxu1 %v2175_v0 }
 0x92a   :  { %v522_v55 = vpop.f32.mrf.mxu1 }
 0x92b   :  { %v528_v56 = vadd.f32 %v522_v55, %v181_v54 }
 0x92c   :  { %v1895_v57 = vpop.f32.mrf.mxu1 }
 0x92d   :  { %v529_v58 = vmul.f32 0.5, %v528_v56 }
 0x92e   :  { %v525_v59 = vpop.f32.mrf.mxu1 }
 0x92f   :  { %v530_v60 = vsel %vm2301_vm5, %v528_v56, %v529_v58  ;;  %v189_v58 = vadd.f32 %v2298_v18, %v2368_v25  ;;  %v729_v25 = vsel %vm728_vm15, 1, %v2177_v1 }
 0x930   :  { %2052 = vtanh.f32 %v530_v60  ;;  %v1896_v61 = vpop.f32.mrf.mxu1 }
 0x93d   :  { %v2053_v62 = vpop.eup %2052 }
 0x93e   :  { %v532_v63 = vadd.f32 1.0, %v2053_v62 }
 0x940   :  { %v533_v2 = vmul.f32 0.5, %v532_v63 }
 0x942   :  { %v534_v4 = vsel %vm2301_vm5, %v2053_v62, %v533_v2 }
 0x943   :  { %537 = vrot.lane.b32.xlu0 %v534_v4, %s2169_s16  ;;  %v535_v9 = vmul.f32 %v534_v4, %v471_v8 }
 0x947   :  { %555 = vperm.xlu0 %2025, %v553_v44  }
 0x9b5   :  { %v538_v6 = vpop.permute.xlu0 %537 }
 0x9b6   :  { %v540_v7 = vmul.f32 %v538_v6, %v534_v4 }
 0x9b8   :  { %542 = vrot.lane.b32.xlu1 %v540_v7, %s2178_s1 }
 0x9c2   :  { %v2412_v15 = vpop.permute.xlu0 %555 }
 0x9c3   :  { %vm557_vm12 = vcmp.eq.s32.totalorder %v2412_v15, 1 }
 0xa2a   :  { %v543_v10 = vpop.permute.xlu1 %542 }
 0xa2b   :  { %v545_v11 = vadd.f32 %v543_v10, %v535_v9 }
 0xa2d   :  { %2054 = vtanh.f32 %v545_v11  ;;  %v559_v45 = vsel %vm557_vm12, %v545_v11, %v471_v8 }
 0xa3a   :  { %v2055_v14 = vpop.eup %2054 }
 0xa3b   :  { %548 = vrot.lane.b32.xlu1 %v2055_v14, %s2169_s16 }
 0xaad   :  { %v549_v16 = vpop.permute.xlu1 %548 }
 0xaae   :  { %v551_v20 = vmul.f32 %v549_v16, %v534_v4 }
 0xab0   :  { %v558_v26 = vsel %vm557_vm12, %v551_v20, %v470_v51 }
 0xab1   :  { %v2417_v27 = vpack.c.bf16 %v558_v26, %v558_v26 }
 0xab3   :  { %571 = vrot.lane.b32.xlu0 %v2417_v27, %s2178_s1 }
 0xb25   :  { %v572_v28 = vpop.permute.xlu0 %571 }
 0xb26   :  { %1902 = vmatmul.mubr.msk.bf16.vlgmr.msra.gmra.mxu0 %vm122_vm1, %v572_v28 }
 0xb27   :  { %1914 = vmatpush3.bf16.msra.mxu0 %v2258_v3  ;;  %1917 = vmatprep.mubr.msk.bf16.mxu0 %vm2176_vm0, %v2175_v0 }
 0xb28   :  { %1915 = vmatprep.subr.bf16.mxu0 %v2175_v0 }
 0xb2b   :  { %1916 = vmatpush3.bf16.msra.mxu0 %v2267_v5 }
 0xbe6   :  { %v610_v30 = vpop.f32.mrf.mxu0 }
 0xbe7   :  { %v616_v31 = vadd.f32 %v610_v30, %v186_v29 }
 0xbe8   :  { %v1903_v32 = vpop.f32.mrf.mxu0 }
 0xbe9   :  { %v617_v33 = vmul.f32 0.5, %v616_v31  ;;  %v194_v32 = vadd.f32 %v2362_v21, %v2298_v18  ;;  %v817_v21 = vsel %vm816_vm3, 1, %v2177_v1 }
 0xbea   :  { %v613_v34 = vpop.f32.mrf.mxu0 }
 0xbeb   :  { %v618_v35 = vsel %vm2301_vm5, %v616_v31, %v617_v33 }
 0xbec   :  { %2056 = vtanh.f32 %v618_v35  ;;  %v1904_v36 = vpop.f32.mrf.mxu0 }
 0xbf9   :  { %v2057_v37 = vpop.eup %2056 }
 0xbfa   :  { %v620_v17 = vadd.f32 1.0, %v2057_v37 }
 0xbfc   :  { %v621_v39 = vmul.f32 0.5, %v620_v17 }
 0xbfe   :  { %v622_v40 = vsel %vm2301_vm5, %v2057_v37, %v621_v39 }
 0xbff   :  { %625 = vrot.lane.b32.xlu1 %v622_v40, %s2169_s16  ;;  %v623_v46 = vmul.f32 %v622_v40, %v559_v45 }
 0xc03   :  { %643 = vperm.xlu1 %2024, %v641_v22  }
 0xc71   :  { %v626_v41 = vpop.permute.xlu1 %625 }
 0xc72   :  { %v628_v43 = vmul.f32 %v626_v41, %v622_v40 }
 0xc74   :  { %630 = vrot.lane.b32.xlu0 %v628_v43, %s2178_s1 }
 0xc7e   :  { %v2440_v51 = vpop.permute.xlu1 %643 }
 0xc7f   :  { %vm645_vm14 = vcmp.eq.s32.totalorder %v2440_v51, 1 }
 0xce6   :  { %v631_v47 = vpop.permute.xlu0 %630 }
 0xce7   :  { %v633_v49 = vadd.f32 %v631_v47, %v623_v46 }
 0xce9   :  { %2058 = vtanh.f32 %v633_v49  ;;  %v647_v9 = vsel %vm645_vm14, %v633_v49, %v559_v45 }
 0xcf6   :  { %v2059_v50 = vpop.eup %2058 }
 0xcf7   :  { %636 = vrot.lane.b32.xlu0 %v2059_v50, %s2169_s16 }
 0xd69   :  { %v637_v53 = vpop.permute.xlu0 %636 }
 0xd6a   :  { %v639_v54 = vmul.f32 %v637_v53, %v622_v40 }
 0xd6c   :  { %v646_v55 = vsel %vm645_vm14, %v639_v54, %v558_v26 }
 0xd6d   :  { %v2445_v56 = vpack.c.bf16 %v646_v55, %v646_v55 }
 0xd6f   :  { %659 = vrot.lane.b32.xlu1 %v2445_v56, %s2178_s1 }
 0xde1   :  { %v660_v57 = vpop.permute.xlu1 %659 }
 0xde2   :  { %1910 = vmatmul.mubr.msk.bf16.vlgmr.msra.gmra.mxu1 %vm122_vm1, %v660_v57  ;;  %v2031_v57 = vld [vmem:[#allocation6] sm:$0xff]  }
 0xde3   :  { %1922 = vmatpush3.bf16.msra.mxu1 %v2258_v3  ;;  %1925 = vmatprep.mubr.msk.bf16.mxu1 %vm2176_vm0, %v2175_v0 }
 0xde4   :  { %1923 = vmatprep.subr.bf16.mxu1 %v2175_v0 }
 0xde7   :  { %1924 = vmatpush3.bf16.msra.mxu1 %v2267_v5 }
 0xde8   :  { %1941 = vmatprep.subr.bf16.mxu1 %v2175_v0 }
 0xea2   :  { %v698_v59 = vpop.f32.mrf.mxu1 }
 0xea3   :  { %v704_v60 = vadd.f32 %v698_v59, %v189_v58 }
 0xea4   :  { %v1911_v61 = vpop.f32.mrf.mxu1 }
 0xea5   :  { %v705_v62 = vmul.f32 0.5, %v704_v60 }
 0xea6   :  { %v701_v63 = vpop.f32.mrf.mxu1 }
 0xea7   :  { %v706_v3 = vsel %vm2301_vm5, %v704_v60, %v705_v62 }
 0xea8   :  { %2060 = vtanh.f32 %v706_v3  ;;  %v1912_v2 = vpop.f32.mrf.mxu1 }
 0xea9   :  { %v2525_v2 = vld [vmem:[#allocation8 + $0x8] sm:$0xff]  }
 0xeb5   :  { %v2061_v4 = vpop.eup %2060 }
 0xeb6   :  { %v708_v44 = vadd.f32 1.0, %v2061_v4 }
 0xeb8   :  { %v709_v6 = vmul.f32 0.5, %v708_v44 }
 0xeba   :  { %v710_v5 = vsel %vm2301_vm5, %v2061_v4, %v709_v6  ;;  %v2530_v4 = vld [vmem:[#allocation8] sm:$0xff]   ;;  %v197_v6 = vadd.f32 %v2366_v23, %v2298_v18 }
 0xebb   :  { %713 = vrot.lane.b32.xlu0 %v710_v5, %s2169_s16  ;;  %v711_v10 = vmul.f32 %v710_v5, %v647_v9 }
 0xebf   :  { %731 = vperm.xlu0 %2025, %v729_v25  }
 0xf2d   :  { %v714_v7 = vpop.permute.xlu0 %713 }
 0xf2e   :  { %v716_v8 = vmul.f32 %v714_v7, %v710_v5 }
 0xf30   :  { %718 = vrot.lane.b32.xlu1 %v716_v8, %s2178_s1 }
 0xf3a   :  { %v2469_v20 = vpop.permute.xlu0 %731 }
 0xf3b   :  { %vm733_vm2 = vcmp.eq.s32.totalorder %v2469_v20, 1 }
 0xfa2   :  { %v719_v11 = vpop.permute.xlu1 %718 }
 0xfa3   :  { %v721_v14 = vadd.f32 %v719_v11, %v711_v10  ;;  %v2555_v11 = vld [vmem:[%s2773_s7] ss:$0 sm:$0xff] }
 0xfa5   :  { %2062 = vtanh.f32 %v721_v14  ;;  %v2499_v53 = vsel %vm733_vm2, %v721_v14, %v647_v9 }
 0xfb2   :  { %v2063_v16 = vpop.eup %2062 }
 0xfb3   :  { %724 = vrot.lane.b32.xlu1 %v2063_v16, %s2169_s16 }
0x1025   :  { %v725_v26 = vpop.permute.xlu1 %724 }
0x1026   :  { %v727_v28 = vmul.f32 %v725_v26, %v710_v5 }
0x1028   :  { %v734_v29 = vsel %vm733_vm2, %v727_v28, %v646_v55  ;;  %v2030_v55 = vld [vmem:[#allocation6 + $0x8] sm:$0xff]  }
0x1029   :  { %v2474_v30 = vpack.c.bf16 %v734_v29, %v734_v29  ;;  %1929 = vmatprep.subr.bf16.mxu0 %v2030_v55 }
0x102b   :  { %747 = vrot.lane.b32.xlu0 %v2474_v30, %s2178_s1 }
0x109d   :  { %v748_v31 = vpop.permute.xlu0 %747 }
0x109e   :  { %1918 = vmatmul.mubr.msk.bf16.vlgmr.msra.gmra.mxu0 %vm122_vm1, %v748_v31 }
0x109f   :  { %1930 = vmatpush3.bf16.msra.mxu0 %v2030_v55 }
0x10a0   :  { %1931 = vmatprep.subr.bf16.mxu0 %v2031_v57 }
0x10a3   :  { %1932 = vmatpush3.bf16.msra.mxu0 %v2031_v57 }
0x10a4   :  { %1957 = vmatprep.subr.bf16.mxu0 %v2175_v0 }
0x115e   :  { %v786_v33 = vpop.f32.mrf.mxu0 }
0x115f   :  { %v792_v34 = vadd.f32 %v786_v33, %v194_v32 }
0x1160   :  { %v1919_v35 = vpop.f32.mrf.mxu0 }
0x1161   :  { %v793_v36 = vmul.f32 0.5, %v792_v34 }
0x1162   :  { %v789_v37 = vpop.f32.mrf.mxu0 }
0x1163   :  { %v794_v17 = vsel %vm2301_vm5, %v792_v34, %v793_v36 }
0x1164   :  { %2064 = vtanh.f32 %v794_v17  ;;  %v1920_v39 = vpop.f32.mrf.mxu0 }
0x1171   :  { %v2065_v40 = vpop.eup %2064 }
0x1172   :  { %v796_v22 = vadd.f32 1.0, %v2065_v40 }
0x1174   :  { %v797_v41 = vmul.f32 0.5, %v796_v22 }
0x1176   :  { %v798_v43 = vsel %vm2301_vm5, %v2065_v40, %v797_v41 }
0x1177   :  { %801 = vrot.lane.b32.xlu1 %v798_v43, %s2169_s16 }
0x117b   :  { %819 = vperm.xlu1 %2024, %v817_v21  }
0x117f   :  { %300 = vrot.lane.b32.xlu1 %v2317_v42, %s2178_s1  ;;  %v799_v42 = vmul.f32 %v798_v43, %v2499_v53 }
0x1183   :  { %476 = vrot.lane.b32.xlu1 %v2388_v52, %s2178_s1 }
0x11e9   :  { %v802_v45 = vpop.permute.xlu1 %801 }
0x11ea   :  { %v804_v46 = vmul.f32 %v802_v45, %v798_v43 }
0x11ec   :  { %806 = vrot.lane.b32.xlu0 %v804_v46, %s2178_s1 }
0x11f6   :  { %v2493_v47 = vpop.permute.xlu1 %819 }
0x11f7   :  { %vm821_vm7 = vcmp.eq.s32.totalorder %v2493_v47, 1 }
0x11fa   :  { %v301_v49 = vpop.permute.xlu1 %300 }
0x11fb   :  { %304 = vst.msk [vmem:[#allocation3] sm:$0xf] %vm303_vm4, %v301_v49 }
0x11fe   :  { %v477_v50 = vpop.permute.xlu1 %476 }
0x11ff   :  { %480 = vst.msk [vmem:[#allocation3 + $0x8] sm:$0xf] %vm303_vm4, %v477_v50 }
0x125e   :  { %v807_v52 = vpop.permute.xlu0 %806 }
0x125f   :  { %v2502_v54 = vadd.f32 %v807_v52, %v799_v42 }
0x1261   :  { %2066 = vtanh.f32 %v2502_v54 }
0x126e   :  { %v2067_v58 = vpop.eup %2066 }
0x126f   :  { %812 = vrot.lane.b32.xlu0 %v2067_v58, %s2169_s16 }
0x1273   :  { %388 = vrot.lane.b32.xlu0 %v2351_v19, %s2178_s1 }
0x1277   :  { %564 = vrot.lane.b32.xlu0 %v2417_v27, %s2178_s1 }
0x12e1   :  { %v813_v59 = vpop.permute.xlu0 %812 }
0x12e2   :  { %v815_v60 = vmul.f32 %v813_v59, %v798_v43 }
0x12e4   :  { %v2514_v61 = vsel %vm821_vm7, %v815_v60, %v734_v29  ;;  %v905_v60 = vsel %vm904_vm9, 1, %v2177_v1 }
0x12e5   :  { %v389_v62 = vpop.permute.xlu0 %388  ;;  %v2518_v63 = vpack.c.bf16 %v2514_v61, %v2514_v61 }
0x12e6   :  { %392 = vst.msk [vmem:[#allocation3 + $0x4] sm:$0xf] %vm303_vm4, %v389_v62 }
0x12e7   :  { %835 = vrot.lane.b32.xlu1 %v2518_v63, %s2178_s1 }
0x12e9   :  { %v565_v19 = vpop.permute.xlu0 %564 }
0x12ea   :  { %568 = vst.msk [vmem:[#allocation3 + $0xc] sm:$0xf] %vm303_vm4, %v565_v19 }
0x12ed   :  { %v2032_v27 = vld [vmem:[#allocation3] sm:$0xff]  }
0x12ee   :  { %1933 = vmatprep.mubr.msk.bf16.mxu0 %vm122_vm1, %v2032_v27 }
0x12f1   :  { %v2033_v3 = vld [vmem:[#allocation3 + $0x8] sm:$0xff]  }
0x12f2   :  { %1934 = vmatmul.mubr.msk.bf16.vlgmr.msra.gmra.mxu0 %vm122_vm1, %v2033_v3 }
0x12f3   :  { %1958 = vmatpush3.bf16.msra.mxu0 %v2525_v2 }
0x12f4   :  { %1959 = vmatprep.subr.bf16.mxu0 %v2175_v0 }
0x12f7   :  { %1960 = vmatpush3.bf16.msra.mxu0 %v2530_v4 }
0x12f8   :  { %1973 = vmatprep.subr.bf16.mxu0 %v2175_v0 }
0x1359   :  { %v836_v44 = vpop.permute.xlu1 %835 }
0x135a   :  { %1926 = vmatmul.mubr.msk.bf16.vlgmr.msra.gmra.mxu1 %vm122_vm1, %v836_v44 }
0x135b   :  { %1942 = vmatpush3.bf16.msra.mxu1 %v2525_v2  ;;  %1945 = vmatprep.mubr.msk.bf16.mxu1 %vm2176_vm0, %v2175_v0 }
0x135c   :  { %1943 = vmatprep.subr.bf16.mxu1 %v2175_v0 }
0x135f   :  { %1944 = vmatpush3.bf16.msra.mxu1 %v2530_v4 }
0x1360   :  { %1949 = vmatprep.subr.bf16.mxu1 %v2175_v0 }
0x1362   :  { %1946 = vmatmul.mubr.bf16.vlgmr.msra.gmra.mxu1 %v2177_v1 }
0x1363   :  { %1950 = vmatpush3.bf16.msra.mxu1 %v2525_v2  ;;  %1953 = vmatprep.mubr.msk.bf16.mxu1 %vm2176_vm0, %v2175_v0 }
0x1364   :  { %1951 = vmatprep.subr.bf16.mxu1 %v2175_v0 }
0x1367   :  { %1952 = vmatpush3.bf16.msra.mxu1 %v2530_v4 }
0x1368   :  { %1965 = vmatprep.subr.bf16.mxu1 %v2175_v0 }
0x13b2   :  { %v2550_v5 = vpop.f32.mrf.mxu0 }
0x13b4   :  { %v1021_v9 = vpop.f32.mrf.mxu0 }
0x13b5   :  { %v1022_v16 = vadd.f32 %v2555_v11, %v1021_v9 }
0x13b6   :  { %v2587_v12 = vpop.f32.mrf.mxu0 }
0x13b7   :  { %v1033_v13 = vadd.f32 %v2587_v12, %v2555_v11 }
0x13b8   :  { %v1024_v19 = vpop.f32.mrf.mxu0 }
0x13b9   :  { %v1025_v1 = vadd.f32 %v2555_v11, %v1024_v19 }
0x141a   :  { %v874_v25 = vpop.f32.mrf.mxu1 }
0x141b   :  { %v880_v7 = vadd.f32 %v874_v25, %v197_v6 }
0x141c   :  { %v1927_v8 = vpop.f32.mrf.mxu1 }
0x141d   :  { %v881_v39 = vmul.f32 0.5, %v880_v7 }
0x141e   :  { %v877_v10 = vpop.f32.mrf.mxu1 }
0x141f   :  { %v882_v40 = vsel %vm2301_vm5, %v880_v7, %v881_v39 }
0x1420   :  { %v1928_v14 = vpop.f32.mrf.mxu1 }
0x1422   :  { %v1107_v26 = vpop.f32.mrf.mxu1 }
0x1423   :  { %v1113_v28 = vadd.f32 %v1107_v26, %v1022_v16  ;;  %v823_v26 = vsel %vm821_vm7, %v2502_v54, %v2499_v53 }
0x1424   :  { %v1947_v29 = vpop.f32.mrf.mxu1 }
0x1425   :  { %v1114_v31 = vmul.f32 0.5, %v1113_v28 }
0x1426   :  { %v1110_v18 = vpop.f32.mrf.mxu1 }
0x1427   :  { %v1115_v23 = vsel %vm2301_vm5, %v1113_v28, %v1114_v31 }
0x1428   :  { %2068 = vtanh.f32 %v1115_v23  ;;  %v1948_v32 = vpop.f32.mrf.mxu1 }
0x1429   :  { %2070 = vtanh.f32 %v882_v40 }
0x1435   :  { %v2069_v33 = vpop.eup %2068 }
0x1436   :  { %v1117_v34 = vadd.f32 1.0, %v2069_v33  ;;  %v2071_v21 = vpop.eup %2070 }
0x1437   :  { %v884_v45 = vadd.f32 1.0, %v2071_v21 }
0x1438   :  { %v1118_v35 = vmul.f32 0.5, %v1117_v34 }
0x1439   :  { %v885_v49 = vmul.f32 0.5, %v884_v45 }
0x143a   :  { %v1119_v36 = vsel %vm2301_vm5, %v2069_v33, %v1118_v35 }
0x143b   :  { %1122 = vrot.lane.b32.xlu0 %v1119_v36, %s2169_s16  ;;  %v1120_v22 = vmul.f32 0.0, %v1119_v36  ;;  %v886_v50 = vsel %vm2301_vm5, %v2071_v21, %v885_v49 }
0x143c   :  { %v887_v29 = vmul.f32 %v886_v50, %v823_v26 }
0x14ad   :  { %v1123_v37 = vpop.permute.xlu0 %1122 }
0x14ae   :  { %v1125_v17 = vmul.f32 %v1123_v37, %v1119_v36 }
0x14b0   :  { %1127 = vrot.lane.b32.xlu1 %v1125_v17, %s2178_s1 }
0x1522   :  { %v1128_v41 = vpop.permute.xlu1 %1127 }
0x1523   :  { %v1130_v43 = vadd.f32 %v1128_v41, %v1120_v22 }
0x1525   :  { %2072 = vtanh.f32 %v1130_v43  ;;  %v1138_v53 = vsel %vm293_vm6, %v1130_v43, 0.0 }
0x1532   :  { %v2073_v46 = vpop.eup %2072 }
0x1533   :  { %1133 = vrot.lane.b32.xlu0 %v2073_v46, %s2169_s16 }
0x1537   :  { %889 = vrot.lane.b32.xlu0 %v886_v50, %s2169_s16 }
0x15a5   :  { %v1134_v42 = vpop.permute.xlu0 %1133 }
0x15a6   :  { %v1136_v52 = vmul.f32 %v1134_v42, %v1119_v36 }
0x15a8   :  { %v2572_v55 = vsel %vm293_vm6, %v1136_v52, 0.0 }
0x15a9   :  { %v1140_v57 = vpack.c.bf16 %v2572_v55, %v2572_v55  ;;  %v890_v58 = vpop.permute.xlu0 %889 }
0x15aa   :  { %v892_v59 = vmul.f32 %v890_v58, %v886_v50 }
0x15ab   :  { %1142 = vrot.lane.b32.xlu1 %v1140_v57, %s2178_s1 }
0x15ac   :  { %894 = vrot.lane.b32.xlu0 %v892_v59, %s2178_s1 }
0x15b0   :  { %907 = vperm.xlu0 %2025, %v905_v60  }
0x161d   :  { %v1143_v62 = vpop.permute.xlu1 %1142 }
0x161e   :  { %1954 = vmatmul.mubr.msk.bf16.vlgmr.msra.gmra.mxu1 %vm122_vm1, %v1143_v62  ;;  %v895_v28 = vpop.permute.xlu0 %894 }
0x161f   :  { %1966 = vmatpush3.bf16.msra.mxu1 %v2525_v2  ;;  %1969 = vmatprep.mubr.msk.bf16.mxu1 %vm2176_vm0, %v2175_v0  ;;  %v897_v31 = vadd.f32 %v895_v28, %v887_v29 }
0x1620   :  { %1967 = vmatprep.subr.bf16.mxu1 %v2175_v0 }
0x1623   :  { %1968 = vmatpush3.bf16.msra.mxu1 %v2530_v4 }
0x1624   :  { %1981 = vmatprep.subr.bf16.mxu1 %v2175_v0 }
0x162b   :  { %v2609_v39 = vpop.permute.xlu0 %907 }
0x162c   :  { %vm909_vm11 = vcmp.eq.s32.totalorder %v2609_v39, 1 }
0x16de   :  { %v1181_v27 = vpop.f32.mrf.mxu1 }
0x16df   :  { %v1187_v3 = vadd.f32 %v1181_v27, %v1025_v1 }
0x16e0   :  { %v1955_v44 = vpop.f32.mrf.mxu1 }
0x16e1   :  { %v1188_v6 = vmul.f32 0.5, %v1187_v3 }
0x16e2   :  { %v1184_v25 = vpop.f32.mrf.mxu1 }
0x16e3   :  { %v1189_v7 = vsel %vm2301_vm5, %v1187_v3, %v1188_v6 }
0x16e4   :  { %2074 = vtanh.f32 %v1189_v7  ;;  %v1956_v8 = vpop.f32.mrf.mxu1 }
0x16e5   :  { %2076 = vtanh.f32 %v897_v31 }
0x16f1   :  { %v2075_v9 = vpop.eup %2074 }
0x16f2   :  { %v1191_v10 = vadd.f32 1.0, %v2075_v9  ;;  %v2077_v32 = vpop.eup %2076 }
0x16f4   :  { %v1192_v14 = vmul.f32 0.5, %v1191_v10 }
0x16f6   :  { %v1193_v16 = vsel %vm2301_vm5, %v2075_v9, %v1192_v14 }
0x16f7   :  { %1196 = vrot.lane.b32.xlu1 %v1193_v16, %s2169_s16  ;;  %v1194_v54 = vmul.f32 %v1193_v16, %v1138_v53 }
0x1769   :  { %v1197_v18 = vpop.permute.xlu1 %1196 }
0x176a   :  { %v1199_v23 = vmul.f32 %v1197_v18, %v1193_v16 }
0x176c   :  { %1201 = vrot.lane.b32.xlu1 %v1199_v23, %s2178_s1 }
0x1770   :  { %900 = vrot.lane.b32.xlu1 %v2077_v32, %s2169_s16 }
0x1774   :  { %652 = vrot.lane.b32.xlu1 %v2445_v56, %s2178_s1 }
0x1778   :  { %828 = vrot.lane.b32.xlu1 %v2518_v63, %s2178_s1 }
0x17de   :  { %v1202_v33 = vpop.permute.xlu1 %1201 }
0x17df   :  { %v1204_v34 = vadd.f32 %v1202_v33, %v1194_v54 }
0x17e1   :  { %2078 = vtanh.f32 %v1204_v34  ;;  %v1212_v7 = vsel %vm381_vm8, %v1204_v34, %v1138_v53 }
0x17e2   :  { %v901_v35 = vpop.permute.xlu1 %900 }
0x17e3   :  { %v903_v56 = vmul.f32 %v901_v35, %v886_v50 }
0x17e5   :  { %v910_v38 = vsel %vm909_vm11, %v903_v56, %v2514_v61 }
0x17e6   :  { %v653_v36 = vpop.permute.xlu1 %652  ;;  %v1789_v63 = vpack.c.bf16 %v910_v38, %v910_v38 }
0x17e7   :  { %656 = vst.msk [vmem:[#allocation3 + $0x10] sm:$0xf] %vm303_vm4, %v653_v36 }
0x17ea   :  { %v829_v37 = vpop.permute.xlu1 %828 }
0x17eb   :  { %832 = vst.msk [vmem:[#allocation3 + $0x18] sm:$0xf] %vm303_vm4, %v829_v37 }
0x17ee   :  { %v2079_v17 = vpop.eup %2078 }
0x17ef   :  { %1207 = vrot.lane.b32.xlu0 %v2079_v17, %s2169_s16 }
0x17f3   :  { %740 = vrot.lane.b32.xlu0 %v2474_v30, %s2178_s1 }
0x17f7   :  { %915 = vrot.lane.b32.xlu0 %v1789_v63, %s2178_s1 }
0x1861   :  { %v1208_v40 = vpop.permute.xlu0 %1207 }
0x1862   :  { %v1210_v22 = vmul.f32 %v1208_v40, %v1193_v16 }
0x1864   :  { %v1211_v41 = vsel %vm381_vm8, %v1210_v22, %v2572_v55  ;;  %v1030_v55 = vadd.f32 %v2550_v5, %v2555_v11 }
0x1865   :  { %v741_v43 = vpop.permute.xlu0 %740  ;;  %v1214_v21 = vpack.c.bf16 %v1211_v41, %v1211_v41 }
0x1866   :  { %744 = vst.msk [vmem:[#allocation3 + $0x14] sm:$0xf] %vm303_vm4, %v741_v43 }
0x1867   :  { %1216 = vrot.lane.b32.xlu1 %v1214_v21, %s2178_s1 }
0x1869   :  { %v916_v45 = vpop.permute.xlu0 %915 }
0x186a   :  { %919 = vst.msk [vmem:[#allocation3 + $0x1c] sm:$0xf] %vm303_vm4, %v916_v45 }
0x186d   :  { %v2036_v61 = vld [vmem:[#allocation3 + $0x10] sm:$0xff]  }
0x186e   :  { %1937 = vmatprep.mubr.msk.bf16.mxu0 %vm122_vm1, %v2036_v61 }
0x1871   :  { %v2037_v30 = vld [vmem:[#allocation3 + $0x18] sm:$0xff]  }
0x1872   :  { %1938 = vmatmul.mubr.msk.bf16.gmra.mxu0 %vm122_vm1, %v2037_v30 }
0x1873   :  { %1961 = vmatprep.mubr.msk.bf16.mxu0 %vm2176_vm0, %v2175_v0 }
0x18d9   :  { %v1217_v46 = vpop.permute.xlu1 %1216 }
0x18da   :  { %1962 = vmatmul.mubr.msk.bf16.vlgmr.msra.gmra.mxu0 %vm122_vm1, %v1217_v46 }
0x18db   :  { %1974 = vmatpush3.bf16.msra.mxu0 %v2525_v2  ;;  %1977 = vmatprep.mubr.msk.bf16.mxu0 %vm2176_vm0, %v2175_v0 }
0x18dc   :  { %1975 = vmatprep.subr.bf16.mxu0 %v2175_v0 }
0x18df   :  { %1976 = vmatpush3.bf16.msra.mxu0 %v2530_v4 }
0x18e0   :  { %1989 = vmatprep.subr.bf16.mxu0 %v2175_v0 }
0x1932   :  { %v2636_v49 = vpop.f32.mrf.mxu0 }
0x1933   :  { %v1046_v51 = vadd.f32 %v2636_v49, %v2555_v11 }
0x1934   :  { %v2638_v50 = vpop.f32.mrf.mxu0 }
0x1935   :  { %v1038_v48 = vadd.f32 %v2555_v11, %v2638_v50 }
0x1936   :  { %v2640_v42 = vpop.f32.mrf.mxu0 }
0x1937   :  { %v1049_v20 = vadd.f32 %v2640_v42, %v2555_v11 }
0x1938   :  { %v2642_v52 = vpop.f32.mrf.mxu0 }
0x1939   :  { %v1041_v15 = vadd.f32 %v2555_v11, %v2642_v52 }
0x199a   :  { %v1255_v57 = vpop.f32.mrf.mxu0 }
0x199b   :  { %v1261_v58 = vadd.f32 %v1255_v57, %v1030_v55 }
0x199c   :  { %v1963_v59 = vpop.f32.mrf.mxu0 }
0x199d   :  { %v1262_v60 = vmul.f32 0.5, %v1261_v58 }
0x199e   :  { %v1258_v62 = vpop.f32.mrf.mxu0 }
0x199f   :  { %v1263_v19 = vsel %vm2301_vm5, %v1261_v58, %v1262_v60 }
0x19a0   :  { %2080 = vtanh.f32 %v1263_v19  ;;  %v1964_v1 = vpop.f32.mrf.mxu0 }
0x19ad   :  { %v2081_v27 = vpop.eup %2080 }
0x19ae   :  { %v1265_v3 = vadd.f32 1.0, %v2081_v27 }
0x19b0   :  { %v1266_v44 = vmul.f32 0.5, %v1265_v3 }
0x19b2   :  { %v1267_v6 = vsel %vm2301_vm5, %v2081_v27, %v1266_v44 }
0x19b3   :  { %1270 = vrot.lane.b32.xlu0 %v1267_v6, %s2169_s16  ;;  %v1268_v8 = vmul.f32 %v1267_v6, %v1212_v7 }
0x1a25   :  { %v1271_v25 = vpop.permute.xlu0 %1270 }
0x1a26   :  { %v1273_v5 = vmul.f32 %v1271_v25, %v1267_v6 }
0x1a28   :  { %1275 = vrot.lane.b32.xlu1 %v1273_v5, %s2178_s1 }
0x1a9a   :  { %v1276_v9 = vpop.permute.xlu1 %1275 }
0x1a9b   :  { %v1278_v10 = vadd.f32 %v1276_v9, %v1268_v8 }
0x1a9d   :  { %2082 = vtanh.f32 %v1278_v10  ;;  %v1286_v38 = vsel %vm469_vm10, %v1278_v10, %v1212_v7 }
0x1aaa   :  { %v2083_v14 = vpop.eup %2082 }
0x1aab   :  { %1281 = vrot.lane.b32.xlu0 %v2083_v14, %s2169_s16 }
0x1b1d   :  { %v1282_v16 = vpop.permute.xlu0 %1281 }
0x1b1e   :  { %v1284_v26 = vmul.f32 %v1282_v16, %v1267_v6 }
0x1b20   :  { %v1285_v28 = vsel %vm469_vm10, %v1284_v26, %v1211_v41 }
0x1b21   :  { %v1288_v29 = vpack.c.bf16 %v1285_v28, %v1285_v28 }
0x1b23   :  { %1290 = vrot.lane.b32.xlu1 %v1288_v29, %s2178_s1 }
0x1b95   :  { %v1291_v31 = vpop.permute.xlu1 %1290 }
0x1b96   :  { %1970 = vmatmul.mubr.msk.bf16.vlgmr.msra.gmra.mxu1 %vm122_vm1, %v1291_v31 }
0x1b97   :  { %1982 = vmatpush3.bf16.msra.mxu1 %v2525_v2  ;;  %1985 = vmatprep.mubr.msk.bf16.mxu1 %vm2176_vm0, %v2175_v0 }
0x1b98   :  { %1983 = vmatprep.subr.bf16.mxu1 %v2175_v0 }
0x1b9b   :  { %1984 = vmatpush3.bf16.msra.mxu1 %v2530_v4 }
0x1b9c   :  { %1997 = vmatprep.subr.bf16.mxu1 %v2175_v0 }
0x1c56   :  { %v1329_v18 = vpop.f32.mrf.mxu1 }
0x1c57   :  { %v1335_v23 = vadd.f32 %v1329_v18, %v1033_v13 }
0x1c58   :  { %v1971_v32 = vpop.f32.mrf.mxu1 }
0x1c59   :  { %v1336_v53 = vmul.f32 0.5, %v1335_v23 }
0x1c5a   :  { %v1332_v54 = vpop.f32.mrf.mxu1 }
0x1c5b   :  { %v1337_v33 = vsel %vm2301_vm5, %v1335_v23, %v1336_v53 }
0x1c5c   :  { %2084 = vtanh.f32 %v1337_v33  ;;  %v1972_v34 = vpop.f32.mrf.mxu1 }
0x1c69   :  { %v2085_v35 = vpop.eup %2084 }
0x1c6a   :  { %v1339_v36 = vadd.f32 1.0, %v2085_v35 }
0x1c6c   :  { %v1340_v37 = vmul.f32 0.5, %v1339_v36 }
0x1c6e   :  { %v1341_v17 = vsel %vm2301_vm5, %v2085_v35, %v1340_v37 }
0x1c6f   :  { %1344 = vrot.lane.b32.xlu0 %v1341_v17, %s2169_s16  ;;  %v1342_v63 = vmul.f32 %v1341_v17, %v1286_v38 }
0x1ce1   :  { %v1345_v56 = vpop.permute.xlu0 %1344 }
0x1ce2   :  { %v1347_v12 = vmul.f32 %v1345_v56, %v1341_v17 }
0x1ce4   :  { %1349 = vrot.lane.b32.xlu1 %v1347_v12, %s2178_s1 }
0x1d56   :  { %v1350_v40 = vpop.permute.xlu1 %1349 }
0x1d57   :  { %v1352_v22 = vadd.f32 %v1350_v40, %v1342_v63 }
0x1d59   :  { %2086 = vtanh.f32 %v1352_v22  ;;  %v1360_v6 = vsel %vm557_vm12, %v1352_v22, %v1286_v38 }
0x1d66   :  { %v2087_v41 = vpop.eup %2086 }
0x1d67   :  { %1355 = vrot.lane.b32.xlu0 %v2087_v41, %s2169_s16 }
0x1dd9   :  { %v1356_v43 = vpop.permute.xlu0 %1355 }
0x1dda   :  { %v1358_v21 = vmul.f32 %v1356_v43, %v1341_v17 }
0x1ddc   :  { %v1359_v45 = vsel %vm557_vm12, %v1358_v21, %v1285_v28 }
0x1ddd   :  { %v1362_v61 = vpack.c.bf16 %v1359_v45, %v1359_v45 }
0x1ddf   :  { %1364 = vrot.lane.b32.xlu1 %v1362_v61, %s2178_s1 }
0x1e51   :  { %v1365_v30 = vpop.permute.xlu1 %1364 }
0x1e52   :  { %1978 = vmatmul.mubr.msk.bf16.vlgmr.msra.gmra.mxu0 %vm122_vm1, %v1365_v30 }
0x1e53   :  { %1990 = vmatpush3.bf16.msra.mxu0 %v2525_v2  ;;  %1993 = vmatprep.mubr.msk.bf16.mxu0 %vm2176_vm0, %v2175_v0 }
0x1e54   :  { %1991 = vmatprep.subr.bf16.mxu0 %v2175_v0 }
0x1e57   :  { %1992 = vmatpush3.bf16.msra.mxu0 %v2530_v4 }
0x1e58   :  { %2005 = vmatprep.subr.bf16.mxu0 %v2175_v0 }
0x1f12   :  { %v1403_v46 = vpop.f32.mrf.mxu0 }
0x1f13   :  { %v1409_v55 = vadd.f32 %v1403_v46, %v1038_v48 }
0x1f14   :  { %v1979_v57 = vpop.f32.mrf.mxu0 }
0x1f15   :  { %v1410_v58 = vmul.f32 0.5, %v1409_v55 }
0x1f16   :  { %v1406_v59 = vpop.f32.mrf.mxu0 }
0x1f17   :  { %v1411_v60 = vsel %vm2301_vm5, %v1409_v55, %v1410_v58 }
0x1f18   :  { %2088 = vtanh.f32 %v1411_v60  ;;  %v1980_v62 = vpop.f32.mrf.mxu0 }
0x1f25   :  { %v2089_v19 = vpop.eup %2088 }
0x1f26   :  { %v1413_v1 = vadd.f32 1.0, %v2089_v19 }
0x1f28   :  { %v1414_v27 = vmul.f32 0.5, %v1413_v1 }
0x1f2a   :  { %v1415_v3 = vsel %vm2301_vm5, %v2089_v19, %v1414_v27 }
0x1f2b   :  { %1418 = vrot.lane.b32.xlu0 %v1415_v3, %s2169_s16  ;;  %v1416_v25 = vmul.f32 %v1415_v3, %v1360_v6 }
0x1f9d   :  { %v1419_v44 = vpop.permute.xlu0 %1418 }
0x1f9e   :  { %v1421_v50 = vmul.f32 %v1419_v44, %v1415_v3 }
0x1fa0   :  { %1423 = vrot.lane.b32.xlu1 %v1421_v50, %s2178_s1 }
0x2012   :  { %v1424_v5 = vpop.permute.xlu1 %1423 }
0x2013   :  { %v1426_v7 = vadd.f32 %v1424_v5, %v1416_v25 }
0x2015   :  { %2090 = vtanh.f32 %v1426_v7  ;;  %v1434_v34 = vsel %vm645_vm14, %v1426_v7, %v1360_v6 }
0x2022   :  { %v2091_v8 = vpop.eup %2090 }
0x2023   :  { %1429 = vrot.lane.b32.xlu0 %v2091_v8, %s2169_s16 }
0x2095   :  { %v1430_v9 = vpop.permute.xlu0 %1429 }
0x2096   :  { %v1432_v10 = vmul.f32 %v1430_v9, %v1415_v3 }
0x2098   :  { %v1433_v14 = vsel %vm645_vm14, %v1432_v10, %v1359_v45 }
0x2099   :  { %v1436_v16 = vpack.c.bf16 %v1433_v14, %v1433_v14 }
0x209b   :  { %1438 = vrot.lane.b32.xlu1 %v1436_v16, %s2178_s1 }
0x210d   :  { %v1439_v26 = vpop.permute.xlu1 %1438 }
0x210e   :  { %1986 = vmatmul.mubr.msk.bf16.vlgmr.msra.gmra.mxu1 %vm122_vm1, %v1439_v26 }
0x210f   :  { %1998 = vmatpush3.bf16.msra.mxu1 %v2525_v2  ;;  %2001 = vmatprep.mubr.msk.bf16.mxu1 %vm2176_vm0, %v2175_v0 }
0x2110   :  { %1999 = vmatprep.subr.bf16.mxu1 %v2175_v0 }
0x2113   :  { %2000 = vmatpush3.bf16.msra.mxu1 %v2530_v4 }
0x21ce   :  { %v1477_v28 = vpop.f32.mrf.mxu1 }
0x21cf   :  { %v1483_v29 = vadd.f32 %v1477_v28, %v1041_v15 }
0x21d0   :  { %v1987_v31 = vpop.f32.mrf.mxu1 }
0x21d1   :  { %v1484_v13 = vmul.f32 0.5, %v1483_v29 }
0x21d2   :  { %v1480_v18 = vpop.f32.mrf.mxu1 }
0x21d3   :  { %v1485_v23 = vsel %vm2301_vm5, %v1483_v29, %v1484_v13 }
0x21d4   :  { %2092 = vtanh.f32 %v1485_v23  ;;  %v1988_v2 = vpop.f32.mrf.mxu1  ;;  %v2038_v23 = vld [vmem:[%s2774_s8 + $0x8] sm:$0xff]  }
0x21e1   :  { %v2093_v32 = vpop.eup %2092 }
0x21e2   :  { %v1487_v53 = vadd.f32 1.0, %v2093_v32 }
0x21e4   :  { %v1488_v54 = vmul.f32 0.5, %v1487_v53 }
0x21e6   :  { %v1489_v33 = vsel %vm2301_vm5, %v2093_v32, %v1488_v54 }
0x21e7   :  { %1492 = vrot.lane.b32.xlu0 %v1489_v33, %s2169_s16  ;;  %v1490_v35 = vmul.f32 %v1489_v33, %v1434_v34 }
0x2259   :  { %v1493_v4 = vpop.permute.xlu0 %1492 }
0x225a   :  { %v1495_v52 = vmul.f32 %v1493_v4, %v1489_v33  ;;  %v1778_v4 = vld [vmem:[%s2775_s9] ss:$0 sm:$0xff] }
0x225c   :  { %1497 = vrot.lane.b32.xlu1 %v1495_v52, %s2178_s1 }
0x22ce   :  { %v1498_v36 = vpop.permute.xlu1 %1497 }
0x22cf   :  { %v1500_v37 = vadd.f32 %v1498_v36, %v1490_v35 }
0x22d1   :  { %2094 = vtanh.f32 %v1500_v37  ;;  %v1508_v59 = vsel %vm733_vm2, %v1500_v37, %v1434_v34 }
0x22de   :  { %v2095_v17 = vpop.eup %2094 }
0x22df   :  { %1503 = vrot.lane.b32.xlu0 %v2095_v17, %s2169_s16 }
0x2351   :  { %v1504_v56 = vpop.permute.xlu0 %1503 }
0x2352   :  { %v1506_v12 = vmul.f32 %v1504_v56, %v1489_v33 }
0x2354   :  { %v1507_v38 = vsel %vm733_vm2, %v1506_v12, %v1433_v14 }
0x2355   :  { %v1510_v63 = vpack.c.bf16 %v1507_v38, %v1507_v38 }
0x2357   :  { %1512 = vrot.lane.b32.xlu1 %v1510_v63, %s2178_s1 }
0x23c9   :  { %v1513_v40 = vpop.permute.xlu1 %1512 }
0x23ca   :  { %1994 = vmatmul.mubr.msk.bf16.vlgmr.msra.gmra.mxu0 %vm122_vm1, %v1513_v40 }
0x23cb   :  { %2009 = vmatprep.mubr.msk.bf16.mxu0 %vm2176_vm0, %v2175_v0  ;;  %2006 = vmatpush3.bf16.msra.mxu0 %v2038_v23  ;;  %vm1726_vm0 = vcmask 23552  }
0x23cc   :  { %2007 = vmatprep.subr.bf16.mxu0 %v2175_v0 }
0x23cf   :  { %2008 = vmatpush3.bf16.msra.mxu0 %v2039_v24 }
0x248a   :  { %v1551_v22 = vpop.f32.mrf.mxu0 }
0x248b   :  { %v1557_v41 = vadd.f32 %v1551_v22, %v1046_v51 }
0x248c   :  { %v1995_v43 = vpop.f32.mrf.mxu0 }
0x248d   :  { %v1558_v21 = vmul.f32 0.5, %v1557_v41 }
0x248e   :  { %v1554_v45 = vpop.f32.mrf.mxu0 }
0x248f   :  { %v1559_v61 = vsel %vm2301_vm5, %v1557_v41, %v1558_v21 }
0x2490   :  { %2096 = vtanh.f32 %v1559_v61  ;;  %v1996_v30 = vpop.f32.mrf.mxu0 }
0x249d   :  { %v2097_v48 = vpop.eup %2096 }
0x249e   :  { %v1561_v46 = vadd.f32 1.0, %v2097_v48 }
0x24a0   :  { %v1562_v55 = vmul.f32 0.5, %v1561_v46 }
0x24a2   :  { %v1563_v57 = vsel %vm2301_vm5, %v2097_v48, %v1562_v55 }
0x24a3   :  { %1566 = vrot.lane.b32.xlu0 %v1563_v57, %s2169_s16  ;;  %v1564_v60 = vmul.f32 %v1563_v57, %v1508_v59 }
0x2515   :  { %v1567_v58 = vpop.permute.xlu0 %1566 }
0x2516   :  { %v1569_v49 = vmul.f32 %v1567_v58, %v1563_v57 }
0x2518   :  { %1571 = vrot.lane.b32.xlu1 %v1569_v49, %s2178_s1 }
0x258a   :  { %v1572_v62 = vpop.permute.xlu1 %1571 }
0x258b   :  { %v1574_v19 = vadd.f32 %v1572_v62, %v1564_v60 }
0x258d   :  { %2098 = vtanh.f32 %v1574_v19  ;;  %v1582_v42 = vsel %vm821_vm7, %v1574_v19, %v1508_v59 }
0x259a   :  { %v2099_v1 = vpop.eup %2098 }
0x259b   :  { %1577 = vrot.lane.b32.xlu0 %v2099_v1, %s2169_s16 }
0x260d   :  { %v1578_v27 = vpop.permute.xlu0 %1577 }
0x260e   :  { %v1580_v3 = vmul.f32 %v1578_v27, %v1563_v57 }
0x2610   :  { %v1581_v44 = vsel %vm821_vm7, %v1580_v3, %v1507_v38 }
0x2611   :  { %v1584_v50 = vpack.c.bf16 %v1581_v44, %v1581_v44 }
0x2613   :  { %1586 = vrot.lane.b32.xlu1 %v1584_v50, %s2178_s1 }
0x2685   :  { %v1587_v6 = vpop.permute.xlu1 %1586 }
0x2686   :  { %2002 = vmatmul.mubr.msk.bf16.vlgmr.msra.gmra.mxu1 %vm122_vm1, %v1587_v6 }
0x2746   :  { %v1625_v25 = vpop.f32.mrf.mxu1 }
0x2747   :  { %v1631_v5 = vadd.f32 %v1625_v25, %v1049_v20 }
0x2748   :  { %v2003_v7 = vpop.f32.mrf.mxu1 }
0x2749   :  { %v1632_v8 = vmul.f32 0.5, %v1631_v5 }
0x274a   :  { %v1628_v9 = vpop.f32.mrf.mxu1 }
0x274b   :  { %v1633_v10 = vsel %vm2301_vm5, %v1631_v5, %v1632_v8 }
0x274c   :  { %2100 = vtanh.f32 %v1633_v10  ;;  %v2004_v14 = vpop.f32.mrf.mxu1 }
0x2759   :  { %v2101_v16 = vpop.eup %2100 }
0x275a   :  { %v1635_v26 = vadd.f32 1.0, %v2101_v16 }
0x275c   :  { %v1636_v15 = vmul.f32 0.5, %v1635_v26 }
0x275e   :  { %v1637_v28 = vsel %vm2301_vm5, %v2101_v16, %v1636_v15 }
0x275f   :  { %1640 = vrot.lane.b32.xlu0 %v1637_v28, %s2169_s16  ;;  %v1638_v31 = vmul.f32 %v1637_v28, %v1582_v42 }
0x27d1   :  { %v1641_v29 = vpop.permute.xlu0 %1640 }
0x27d2   :  { %v1643_v11 = vmul.f32 %v1641_v29, %v1637_v28 }
0x27d4   :  { %1645 = vrot.lane.b32.xlu1 %v1643_v11, %s2178_s1 }
0x2846   :  { %v1646_v13 = vpop.permute.xlu1 %1645 }
0x2847   :  { %v1648_v18 = vadd.f32 %v1646_v13, %v1638_v31 }
0x2849   :  { %2102 = vtanh.f32 %v1648_v18 }
0x2856   :  { %v2103_v2 = vpop.eup %2102 }
0x2857   :  { %1651 = vrot.lane.b32.xlu0 %v2103_v2, %s2169_s16 }
0x28c9   :  { %v1652_v47 = vpop.permute.xlu0 %1651 }
0x28ca   :  { %v1654_v32 = vmul.f32 %v1652_v47, %v1637_v28 }
0x28cc   :  { %v1655_v53 = vsel %vm909_vm11, %v1654_v32, %v1581_v44 }
0x28cd   :  { %v1656_v54 = vpack.c.bf16 %v1655_v53, %v1655_v53 }
0x28cf   :  { %1669 = vrot.lane.b32.xlu1 %v1656_v54, %s2178_s1 }
0x2941   :  { %v1670_v33 = vpop.permute.xlu1 %1669 }
0x2942   :  { %2010 = vmatmul.mubr.msk.bf16.vlgmr.msra.gmra.mxu0 %vm122_vm1, %v1670_v33 }
0x2a02   :  { %v1720_v0 = vpop.f32.mrf.mxu0 }
0x2a03   :  { %v1721_v52 = vadd.f32 %v1778_v4, %v1720_v0 }
0x2a04   :  { %v2011_v34 = vpop.f32.mrf.mxu0 }
0x2a05   :  { %1727 = vst.msk [vmem:[%s2776_s10] sm:$0xff] %vm1726_vm0, %v1721_v52 }
0x2a06   :  { %v1723_v39 = vpop.f32.mrf.mxu0 }
0x2a08   :  { %v2012_v35 = vpop.f32.mrf.mxu0 }
0x2a09   :  { %1732 = vsyncpa [#allocation5], 1 }
0x2a0a   :  { %1733 = vsyncpa [#allocation7], 1 }

</bundles_post_ra>
